<compile_context>
chip_gen: v7x
topology: tpu7x:2x2x1
jax: 0.10.0
libtpu: 0.0.40
codegen_flags: <defaults>
</compile_context>

<pallas_src>
import functools

import jax
import jax.numpy as jnp
from jax import lax
from jax.experimental import pallas as pl
from jax.experimental.pallas import tpu as pltpu

LEAKY_SLOPE = 0.2
MASK_VALUE = -1e30
HPAD = 128          # lane padding for the per-head attention components (heads <= 128)


def _round_up(v, m):
    return ((v + m - 1) // m) * m


def _pick_tile_m():
    # 256-row tiles fill the 256-wide MXU on v6e / v7x; v5e's MXUs are 128x128.
    try:
        kind = jax.devices()[0].device_kind.lower()
    except Exception:
        return 128
    if "v5" in kind:
        return 128
    if "v6" in kind or "v7" in kind or "7x" in kind:
        return 256
    return 128


# ----------------------------------------------------------------------------
# Kernel 1: feature transform  XW = X @ W  (+ per-head attention components)
# ----------------------------------------------------------------------------
def _emit_transform_outputs(xw_f32, asrc_wt, adst_w, xw_ref, adst_ref, asrc_t_ref):
    # XW stored in bf16: halves HBM + VMEM and feeds the stage-2 MXU directly.
    xw_ref[...] = xw_f32.astype(jnp.bfloat16)
    # Attention-logit components stay f32 (tiny matmuls; exp() is error-sensitive).
    # a_dst in destination-major layout [node, head]:
    adst_ref[...] = jnp.dot(xw_f32, adst_w, preferred_element_type=jnp.float32)
    # a_src emitted already transposed ([head, node]) so stage 2 can broadcast it
    # over destination rows with no transpose / extra HBM round trip in between.
    h_sub = asrc_t_ref.shape[0]
    asrc_t_full = lax.dot_general(
        asrc_wt, xw_f32,
        dimension_numbers=(((1,), (1,)), ((), ())),     # contract feature dims
        preferred_element_type=jnp.float32)             # [HPAD, tm]
    asrc_t_ref[...] = asrc_t_full[:h_sub, :]


def _transform_kernel_single(x_ref, w_ref, asrc_w_ref, adst_w_ref,
                             xw_ref, adst_ref, asrc_t_ref):
    # Single matmul per row tile (no K axis / accumulator) -- X and W fed as bf16.
    xw = jnp.dot(x_ref[...].astype(jnp.bfloat16), w_ref[...],
                 preferred_element_type=jnp.float32)
    _emit_transform_outputs(xw, asrc_w_ref[...], adst_w_ref[...],
                            xw_ref, adst_ref, asrc_t_ref)


def _transform_kernel_ksplit(x_ref, w_ref, asrc_w_ref, adst_w_ref,
                             xw_ref, adst_ref, asrc_t_ref, acc_ref):
    k = pl.program_id(1)

    @pl.when(k == 0)
    def _():
        acc_ref[...] = jnp.zeros_like(acc_ref)

    acc_ref[...] += jnp.dot(x_ref[...].astype(jnp.bfloat16), w_ref[...],
                            preferred_element_type=jnp.float32)

    @pl.when(k == pl.num_programs(1) - 1)
    def _():
        _emit_transform_outputs(acc_ref[...], asrc_w_ref[...], adst_w_ref[...],
                                xw_ref, adst_ref, asrc_t_ref)


def transform(x_pad, lp, *, heads, tm):
    n_pad, f_in_pad = x_pad.shape
    hc_pad = lp["w"].shape[1]
    h_sub = _round_up(heads, 8)

    out_shape = (
        jax.ShapeDtypeStruct((n_pad, hc_pad), jnp.bfloat16),   # XW (bf16 MXU feed)
        jax.ShapeDtypeStruct((n_pad, HPAD), jnp.float32),      # a_dst  [node, head]
        jax.ShapeDtypeStruct((h_sub, n_pad), jnp.float32),     # a_src^T [head, node]
    )

    if f_in_pad <= 512:
        grid = (n_pad // tm,)
        in_specs = [
            pl.BlockSpec((tm, f_in_pad), lambda i: (i, 0)),
            pl.BlockSpec((f_in_pad, hc_pad), lambda i: (0, 0)),
            pl.BlockSpec((HPAD, hc_pad), lambda i: (0, 0)),
            pl.BlockSpec((hc_pad, HPAD), lambda i: (0, 0)),
        ]
        out_specs = [
            pl.BlockSpec((tm, hc_pad), lambda i: (i, 0)),
            pl.BlockSpec((tm, HPAD), lambda i: (i, 0)),
            pl.BlockSpec((h_sub, tm), lambda i: (0, i)),
        ]
        kernel = _transform_kernel_single
        scratch = []
        dims = ("parallel",)
    else:
        tk = 512 if f_in_pad % 512 == 0 else (256 if f_in_pad % 256 == 0 else 128)
        grid = (n_pad // tm, f_in_pad // tk)
        in_specs = [
            pl.BlockSpec((tm, tk), lambda i, k: (i, k)),
            pl.BlockSpec((tk, hc_pad), lambda i, k: (k, 0)),
            pl.BlockSpec((HPAD, hc_pad), lambda i, k: (0, 0)),
            pl.BlockSpec((hc_pad, HPAD), lambda i, k: (0, 0)),
        ]
        out_specs = [
            pl.BlockSpec((tm, hc_pad), lambda i, k: (i, 0)),
            pl.BlockSpec((tm, HPAD), lambda i, k: (i, 0)),
            pl.BlockSpec((h_sub, tm), lambda i, k: (0, i)),
        ]
        kernel = _transform_kernel_ksplit
        scratch = [pltpu.VMEM((tm, hc_pad), jnp.float32)]
        dims = ("parallel", "arbitrary")

    return pl.pallas_call(
        kernel,
        out_shape=out_shape,
        grid_spec=pltpu.PrefetchScalarGridSpec(
            num_scalar_prefetch=0,
            grid=grid,
            in_specs=in_specs,
            out_specs=out_specs,
            scratch_shapes=scratch,
        ),
        compiler_params=pltpu.CompilerParams(
            dimension_semantics=dims,
            vmem_limit_bytes=32 * 1024 * 1024),
    )(x_pad, lp["w"], lp["asrc_wt"], lp["adst_w"])


# ----------------------------------------------------------------------------
# Kernel 2: masked attention softmax + aggregation, source-tiled (flash-style
# online softmax over source tiles; destination tiles are megacore-parallel).
# ----------------------------------------------------------------------------
def _attention_aggregate_kernel(adj_ref, adst_ref, asrc_t_ref, xw_ref, b_ref,
                                o_ref, m_sc, l_sc, acc_sc,
                                *, heads, c_pad, tkv, neg_slope):
    j = pl.program_id(1)

    @pl.when(j == 0)
    def _():
        # m starts at 0 (not -inf): real logits are O(1) here and masked entries
        # sit at MASK_VALUE, so exp(MASK_VALUE - m) underflows to exactly 0 for
        # every source tile while m stays monotone non-decreasing and >= 0.
        m_sc[...] = jnp.zeros_like(m_sc)
        l_sc[...] = jnp.zeros_like(l_sc)
        acc_sc[...] = jnp.zeros_like(acc_sc)

    # int8 {0,1} adjacency tile -> additive -1e30 bias (computed once, reused by
    # every head; 4x less HBM stream than an f32 bias matrix).
    neg = (adj_ref[...].astype(jnp.float32) - 1.0) * (-MASK_VALUE)   # [tm, tkv]

    row0 = pl.multiple_of(j * tkv, tkv)                              # src-tile offset

    # Static unroll over the (small) head count: with the source dimension tiled
    # to tkv, the per-head temporaries are only [tm, tkv] so live ranges stay
    # bounded; the online-softmax state lives in VMEM scratch.
    for h in range(heads):
        logit = adst_ref[:, h:h + 1] + asrc_t_ref[h:h + 1, :]        # [tm, tkv]
        logit = jnp.maximum(logit, neg_slope * logit)                # LeakyReLU
        logit = logit + neg                                          # mask non-edges

        m_prev = m_sc[h]                                             # [tm, 1]
        m_new = jnp.maximum(m_prev, jnp.max(logit, axis=-1, keepdims=True))
        alpha = jnp.exp(m_prev - m_new)
        p = jnp.exp(logit - m_new)                                   # masked -> 0
        l_sc[h] = alpha * l_sc[h] + jnp.sum(p, axis=-1, keepdims=True)
        m_sc[h] = m_new

        # P @ XW_h on the MXU: bf16 operands, f32 accumulation.
        xw_h = xw_ref[pl.ds(row0, tkv), pl.ds(h * c_pad, c_pad)]     # [tkv, c_pad]
        acc_sc[h] = alpha * acc_sc[h] + jnp.dot(
            p.astype(jnp.bfloat16), xw_h, preferred_element_type=jnp.float32)

    @pl.when(j == pl.num_programs(1) - 1)
    def _():
        out = jnp.zeros(o_ref.shape, jnp.float32)
        for h in range(heads):
            # reciprocal on the EUP keeps the divide off the VPU critical path
            out = out + acc_sc[h] * pl.reciprocal(l_sc[h], approx=True)
        o_ref[...] = (out * (1.0 / heads) + b_ref[...]).astype(o_ref.dtype)


def attention_aggregate(adj, adst, asrc_t, xw, b_pad, *, heads, c_pad, tm, tkv,
                        neg_slope=LEAKY_SLOPE):
    n_pad = adj.shape[0]
    h_sub = asrc_t.shape[0]
    hc_pad = xw.shape[1]
    kernel = functools.partial(_attention_aggregate_kernel, heads=heads,
                               c_pad=c_pad, tkv=tkv, neg_slope=neg_slope)
    return pl.pallas_call(
        kernel,
        out_shape=jax.ShapeDtypeStruct((n_pad, c_pad), jnp.float32),
        grid_spec=pltpu.PrefetchScalarGridSpec(
            num_scalar_prefetch=0,
            grid=(n_pad // tm, n_pad // tkv),
            in_specs=[
                pl.BlockSpec((tm, tkv), lambda i, j: (i, j)),       # int8 adjacency
                pl.BlockSpec((tm, HPAD), lambda i, j: (i, 0)),      # a_dst tile
                pl.BlockSpec((h_sub, tkv), lambda i, j: (0, j)),    # a_src^T tile
                # XW stays resident in VMEM (bf16 halves its footprint); constant
                # index map -> fetched once.  For very large N add
                # pipeline_mode=pl.Buffered(1) here to drop the 2nd pipeline copy.
                pl.BlockSpec((n_pad, hc_pad), lambda i, j: (0, 0)),
                pl.BlockSpec((1, c_pad), lambda i, j: (0, 0)),      # bias
            ],
            out_specs=pl.BlockSpec((tm, c_pad), lambda i, j: (i, 0)),
            scratch_shapes=[
                pltpu.VMEM((heads, tm, 1), jnp.float32),     # running max  m
                pltpu.VMEM((heads, tm, 1), jnp.float32),     # running sum  l
                pltpu.VMEM((heads, tm, c_pad), jnp.float32),  # weighted accumulator
            ],
        ),
        compiler_params=pltpu.CompilerParams(
            dimension_semantics=("parallel", "arbitrary"),
            vmem_limit_bytes=48 * 1024 * 1024),
    )(adj, adst, asrc_t, xw, b_pad)


# ----------------------------------------------------------------------------
# One GATConv layer (concat=False) via the two pallas_calls
# ----------------------------------------------------------------------------
def gat_conv_layer(adj, x_pad, lp, *, heads, tm, tkv):
    xw, adst, asrc_t = transform(x_pad, lp, heads=heads, tm=tm)
    return attention_aggregate(adj, adst, asrc_t, xw, lp["b"],
                               heads=heads, c_pad=lp["c_pad"], tm=tm, tkv=tkv)


# ----------------------------------------------------------------------------
# Glue: dense int8 adjacency (1 where edge j->i or self loop, else 0)
# ----------------------------------------------------------------------------
def build_adjacency(edge_index, n_pad):
    src, dst = edge_index[0], edge_index[1]
    a = jnp.zeros((n_pad, n_pad), jnp.int8)
    a = a.at[dst, src].set(1)                    # A[dst, src] = 1 (dedups)
    idx = jnp.arange(n_pad)
    a = a.at[idx, idx].set(1)                    # self loops (incl. padded rows)
    return a


# ----------------------------------------------------------------------------
# Parameter init (glorot-ish, deterministic) + lane-padded packing
# ----------------------------------------------------------------------------
def init_gat_params(key, n_layers, in_features, hidden_features, out_features,
                    heads):
    if n_layers == 1:
        dims = [(in_features, out_features)]
    else:
        dims = ([(in_features, hidden_features)]
                + [(hidden_features, hidden_features)] * (n_layers - 2)
                + [(hidden_features, out_features)])

    raw, padded = [], []
    for (f_in, c_out) in dims:
        key, kw, ka = jax.random.split(key, 3)
        lim_w = (6.0 / (f_in + heads * c_out)) ** 0.5
        w = jax.random.uniform(kw, (f_in, heads * c_out), jnp.float32,
                               -lim_w, lim_w)
        lim_a = (6.0 / (c_out + 1)) ** 0.5
        att = jax.random.uniform(ka, (2, heads, c_out), jnp.float32,
                                 -lim_a, lim_a)
        att_src, att_dst = att[0], att[1]
        b = jnp.zeros((c_out,), jnp.float32)
        raw.append((w, att_src, att_dst, b))

        f_in_pad = _round_up(f_in, 128)
        c_pad = _round_up(c_out, 128)
        hc_pad = heads * c_pad

        w_pad = jnp.zeros((f_in_pad, hc_pad), jnp.float32)
        for hh in range(heads):
            w_pad = w_pad.at[:f_in, hh * c_pad:hh * c_pad + c_out].set(
                w[:, hh * c_out:(hh + 1) * c_out])

        def att_cols(att_hc):
            # column hh holds head hh's attention vector at its c_pad row block
            m = jnp.zeros((hc_pad, HPAD), jnp.float32)
            for hh in range(heads):
                m = m.at[hh * c_pad:hh * c_pad + c_out, hh].set(att_hc[hh])
            return m

        b_pad = jnp.zeros((1, c_pad), jnp.float32).at[0, :c_out].set(b)
        padded.append(dict(
            w=w_pad.astype(jnp.bfloat16),            # bf16 into the MXU
            adst_w=att_cols(att_dst),                 # [hc_pad, HPAD] f32
            asrc_wt=att_cols(att_src).T,              # [HPAD, hc_pad] f32
            b=b_pad,
            f_in=f_in, f_in_pad=f_in_pad,
            c_out=c_out, c_pad=c_pad))
    return raw, padded


# ----------------------------------------------------------------------------
# Full GAT forward (eval mode)
# ----------------------------------------------------------------------------
def gat_forward(padded_params, x, edge_index, heads, *, tm=None, tkv=256):
    if tm is None:
        tm = _pick_tile_m()
    assert heads <= HPAD
    n, f_in = x.shape
    n_pad = _round_up(n, max(tm, tkv))
    assert n_pad % tm == 0 and n_pad % tkv == 0
    adj = build_adjacency(edge_index, n_pad)

    f_in_pad0 = padded_params[0]["f_in_pad"]
    h = jnp.zeros((n_pad, f_in_pad0), jnp.float32).at[:n, :f_in].set(x)
    for lp in padded_params:
        h = gat_conv_layer(adj, h, lp, heads=heads, tm=tm, tkv=tkv)
    return h[:n, :padded_params[-1]["c_out"]]


# ----------------------------------------------------------------------------
# Pure-JAX dense reference (same math, unpadded, f32) for a sanity check
# ----------------------------------------------------------------------------
def gat_reference(x, edge_index, raw_params, heads, neg_slope=LEAKY_SLOPE):
    n = x.shape[0]
    a = jnp.zeros((n, n), dtype=bool)
    a = a.at[edge_index[1], edge_index[0]].set(True)
    idx = jnp.arange(n)
    a = a.at[idx, idx].set(True)
    h = x
    for (w, att_src, att_dst, b) in raw_params:
        c_out = att_src.shape[1]
        hw = (h @ w).reshape(n, heads, c_out)
        al_s = (hw * att_src[None, :, :]).sum(-1)       # [n, heads]
        al_d = (hw * att_dst[None, :, :]).sum(-1)
        logits = al_d[:, None, :] + al_s[None, :, :]    # [dst, src, heads]
        logits = jnp.where(logits >= 0.0, logits, neg_slope * logits)
        logits = jnp.where(a[:, :, None], logits, -jnp.inf)
        p = jax.nn.softmax(logits, axis=1)
        out = jnp.einsum('dsh,shc->dhc', p, hw)
        h = out.mean(axis=1) + b[None, :]
    return h


# ----------------------------------------------------------------------------
if __name__ == "__main__":
    key = jax.random.PRNGKey(0)

    # small synthetic graph
    num_nodes = 200
    num_edges = 800
    in_features = 32
    hidden_features = 64
    out_features = 8
    heads = 4
    n_layers = 3

    key, kx, ke, kp = jax.random.split(key, 4)
    x = jax.random.normal(kx, (num_nodes, in_features), jnp.float32)
    edge_index = jax.random.randint(ke, (2, num_edges), 0, num_nodes,
                                    dtype=jnp.int32)

    raw_params, padded_params = init_gat_params(
        kp, n_layers, in_features, hidden_features, out_features, heads)

    out = gat_forward(padded_params, x, edge_index, heads)
    out = jax.block_until_ready(out)
    assert out.shape == (num_nodes, out_features)

    # sanity check vs dense pure-JAX f32 reference (bf16 matmuls -> loose tol)
    ref = gat_reference(x, edge_index, raw_params, heads)
    max_diff = float(jnp.max(jnp.abs(out - ref)))
    assert max_diff < 5e-2, f"kernel vs reference mismatch: {max_diff}"

    print("KERNEL_OK")
</pallas_src>

<mosaic_0001>
module attributes {stable_mosaic.version = 11 : i64} {
  func.func @_transform_kernel_single(%arg0: i32, %arg1: memref<128x128xf32, #tpu.memory_space<vmem>>, %arg2: memref<128x512xbf16, #tpu.memory_space<vmem>>, %arg3: memref<128x512xf32, #tpu.memory_space<vmem>>, %arg4: memref<512x128xf32, #tpu.memory_space<vmem>>, %arg5: memref<128x512xbf16, #tpu.memory_space<vmem>>, %arg6: memref<128x128xf32, #tpu.memory_space<vmem>>, %arg7: memref<8x128xf32, #tpu.memory_space<vmem>>) attributes {dimension_semantics = [#tpu.dimension_semantics<parallel>], iteration_bounds = array<i64: 2>, scalar_prefetch = 0 : i64, scratch_operands = 0 : i64, tpu.core_type = #tpu.core_type<tc>, window_params = [{transform_indices = @transform_0, window_bounds = array<i64: 128, 128>}, {pipeline_mode = #tpu.pipeline_mode<synchronous>, transform_indices = @transform_1, window_bounds = array<i64: 128, 512>}, {pipeline_mode = #tpu.pipeline_mode<synchronous>, transform_indices = @transform_2, window_bounds = array<i64: 128, 512>}, {pipeline_mode = #tpu.pipeline_mode<synchronous>, transform_indices = @transform_3, window_bounds = array<i64: 512, 128>}, {transform_indices = @transform_4, window_bounds = array<i64: 128, 512>}, {transform_indices = @transform_5, window_bounds = array<i64: 128, 128>}, {transform_indices = @transform_6, window_bounds = array<i64: 8, 128>}]} {
    %c0 = arith.constant 0 : index
    %c0_0 = arith.constant 0 : index
    %0 = vector.load %arg1[%c0, %c0_0] : memref<128x128xf32, #tpu.memory_space<vmem>>, vector<128x128xf32>
    %1 = arith.truncf %0 : vector<128x128xf32> to vector<128x128xbf16>
    %c0_1 = arith.constant 0 : index
    %c0_2 = arith.constant 0 : index
    %2 = vector.load %arg2[%c0_1, %c0_2] : memref<128x512xbf16, #tpu.memory_space<vmem>>, vector<128x512xbf16>
    %cst = arith.constant dense<0.000000e+00> : vector<128x512xf32>
    %3 = tpu.matmul %1, %2, %cst {dimension_numbers = #tpu.dot_dimension_numbers<[1], [0], [0], [1], [0, 0, 1, 1], [], []>} : vector<128x128xbf16>, vector<128x512xbf16>, vector<128x512xf32> -> vector<128x512xf32>
    %c0_3 = arith.constant 0 : index
    %c0_4 = arith.constant 0 : index
    %4 = vector.load %arg3[%c0_3, %c0_4] : memref<128x512xf32, #tpu.memory_space<vmem>>, vector<128x512xf32>
    %c0_5 = arith.constant 0 : index
    %c0_6 = arith.constant 0 : index
    %5 = vector.load %arg4[%c0_5, %c0_6] : memref<512x128xf32, #tpu.memory_space<vmem>>, vector<512x128xf32>
    %6 = arith.truncf %3 : vector<128x512xf32> to vector<128x512xbf16>
    %c0_7 = arith.constant 0 : index
    %c0_8 = arith.constant 0 : index
    %7 = vector.load %arg5[%c0_7, %c0_8] : memref<128x512xbf16, #tpu.memory_space<vmem>>, vector<128x512xbf16>
    tpu.vector_store %arg5[%c0_7, %c0_8], %6 {strides = array<i32>} : memref<128x512xbf16, #tpu.memory_space<vmem>>, vector<128x512xbf16>,
    %cst_9 = arith.constant dense<0.000000e+00> : vector<128x128xf32>
    %8 = tpu.matmul %3, %5, %cst_9 {dimension_numbers = #tpu.dot_dimension_numbers<[1], [0], [0], [1], [0, 0, 1, 1], [], []>} : vector<128x512xf32>, vector<512x128xf32>, vector<128x128xf32> -> vector<128x128xf32>
    %c0_10 = arith.constant 0 : index
    %c0_11 = arith.constant 0 : index
    %9 = vector.load %arg6[%c0_10, %c0_11] : memref<128x128xf32, #tpu.memory_space<vmem>>, vector<128x128xf32>
    tpu.vector_store %arg6[%c0_10, %c0_11], %8 {strides = array<i32>} : memref<128x128xf32, #tpu.memory_space<vmem>>, vector<128x128xf32>,
    %cst_12 = arith.constant dense<0.000000e+00> : vector<128x128xf32>
    %10 = tpu.matmul %4, %3, %cst_12 {dimension_numbers = #tpu.dot_dimension_numbers<[1], [1], [0], [0], [0, 0, 1, 0], [], []>} : vector<128x512xf32>, vector<128x512xf32>, vector<128x128xf32> -> vector<128x128xf32>
    %11 = vector.extract_strided_slice %10 {offsets = [0, 0], sizes = [8, 128], strides = [1, 1]} : vector<128x128xf32> to vector<8x128xf32>
    %c0_13 = arith.constant 0 : index
    %c0_14 = arith.constant 0 : index
    %12 = vector.load %arg7[%c0_13, %c0_14] : memref<8x128xf32, #tpu.memory_space<vmem>>, vector<8x128xf32>
    tpu.vector_store %arg7[%c0_13, %c0_14], %11 {strides = array<i32>} : memref<8x128xf32, #tpu.memory_space<vmem>>, vector<8x128xf32>,
    return
  }
  func.func @transform_0(%arg0: i32) -> (i32, i32) {
    %c0_i32 = arith.constant 0 : i32
    %c0_i32_0 = arith.constant 0 : i32
    return %arg0, %c0_i32 : i32, i32
  }
  func.func @transform_1(%arg0: i32) -> (i32, i32) {
    %c0_i32 = arith.constant 0 : i32
    %c0_i32_0 = arith.constant 0 : i32
    %c0_i32_1 = arith.constant 0 : i32
    return %c0_i32, %c0_i32_0 : i32, i32
  }
  func.func @transform_2(%arg0: i32) -> (i32, i32) {
    %c0_i32 = arith.constant 0 : i32
    %c0_i32_0 = arith.constant 0 : i32
    %c0_i32_1 = arith.constant 0 : i32
    return %c0_i32, %c0_i32_0 : i32, i32
  }
  func.func @transform_3(%arg0: i32) -> (i32, i32) {
    %c0_i32 = arith.constant 0 : i32
    %c0_i32_0 = arith.constant 0 : i32
    %c0_i32_1 = arith.constant 0 : i32
    return %c0_i32, %c0_i32_0 : i32, i32
  }
  func.func @transform_4(%arg0: i32) -> (i32, i32) {
    %c0_i32 = arith.constant 0 : i32
    %c0_i32_0 = arith.constant 0 : i32
    return %arg0, %c0_i32 : i32, i32
  }
  func.func @transform_5(%arg0: i32) -> (i32, i32) {
    %c0_i32 = arith.constant 0 : i32
    %c0_i32_0 = arith.constant 0 : i32
    return %arg0, %c0_i32 : i32, i32
  }
  func.func @transform_6(%arg0: i32) -> (i32, i32) {
    %c0_i32 = arith.constant 0 : i32
    %c0_i32_0 = arith.constant 0 : i32
    return %c0_i32, %arg0 : i32, i32
  }
}

</mosaic_0001>

<bundles_post_ra>
// kernel: tpu_custom_call.1
= control target key start
LH: loop header
LB: loop body
LE: loop exit
PB: predicated region body
PF: predicated region fallthrough
CT: control target
= control target key end

     0   :  { %12 = vsyncpa [#allocation3], 0  ;;  %s3265_s0 = inlined_call_operand.hbm [shape: f32[256,128], index: 0, kind: input, shape index: {}]   ;;  %s3266_s1 = inlined_call_operand.hbm [shape: bf16[128,512], index: 1, kind: input, shape index: {}]   ;;  %s3267_s2 = inlined_call_operand.hbm [shape: f32[128,512], index: 2, kind: input, shape index: {}]   ;;  %s3268_s3 = inlined_call_operand.hbm [shape: f32[512,128], index: 3, kind: input, shape index: {}]   ;;  %s3269_s4 = inlined_call_operand.hbm [shape: bf16[256,512], index: 4, kind: output, shape index: {0}]   ;;  %s3270_s5 = inlined_call_operand.hbm [shape: f32[256,128], index: 5, kind: output, shape index: {1}]   ;;  %s3271_s6 = inlined_call_operand.hbm [shape: f32[8,256], index: 6, kind: output, shape index: {2}]  }
   0x1   :  { %14 = vsyncpa [#allocation3 + $0x1], 0 }
   0x2   :  { %15 = vsyncpa [#allocation6], 0 }
   0x3   :  { %16 = vsyncpa [#allocation9], 0 }
   0x4   :  { %17 = vsyncpa [#allocation4], 0 }
   0x5   :  { %19 = vsyncpa [#allocation4 + $0x1], 0 }
   0x6   :  { %20 = vsyncpa [#allocation12], 0 }
   0x7   :  { %22 = vsyncpa [#allocation12 + $0x1], 0  ;;  %s2781_s21 = smov 0   ;;  %s2783_s22 = smov 0  }
   0x8   :  { %s2785_s23 = smov 0   ;;  %s2787_s24 = smov 0  }
   0x9 LB: > { %s2802_s25 = sadd.s32 4294967295, %s2726_s24   ;;  %s3273_s26 = sadd.s32 4294967294, %s2726_s24   ;;  %s2726_s24 = sphi %s2787_s24, %s3296_s24   ;;  %s2722_s23 = sphi %s2785_s23, %s3295_s23   ;;  %s2718_s22 = sphi %s2783_s22, %s3294_s22   ;;  %s2714_s21 = sphi %s2781_s21, %s3293_s21  }
   0xa   : > { %p48_p0 = scmp.ne.s32.totalorder %s2718_s22, %s2714_s21  ;;  %p3272_p1 = scmp.eq.s32.totalorder %s2802_s25, 0 }
   0xb   : > { %p141_p3 = scmp.eq.s32.totalorder %s3273_s26, 1  ;;  %p1915_p5 = scmp.ge.s32.totalorder %s2726_s24, 1 }
   0xc   : > { %p2813_p4 = por %p3272_p1, %p48_p0  ;;  %p200_p7 = scmp.lt.s32.totalorder %s2726_s24, 3 }
   0xd   : > { %p2818_p6 = por %p141_p3, %p48_p0  ;;  %s2728_s30 = smov [#allocation5]  }
   0xe   : > { %s3276_s27 = scalar_select %p2813_p4, 1, 0 }
   0xf   : > { %s3277_s28 = scalar_select %p2818_p6, 1, 0 }
  0x10   : > { %p2823_p8 = pnand %p1915_p5, %p200_p7  ;;  %s212_s7 = sshll.u32 %s2728_s30, 4  ;;  %s2827_s7 = int_to_ptr.vmem [resolvable:$true] %s212_s7 }
  0x11   : > { %s2729_s9 = smov [#allocation7]   ;;  %s2478_s13 = scalar_lea.hbm %s3266_s1, 4096 }
  0x12   : > { %s3278_s29 = scalar_select %p2823_p8, 1, 0 }
  0x13   : > { %p2352_p9 = pneg %p2823_p8  ;;  %s225_s10 = sshll.u32 %s2729_s9, 4  ;;  %s2838_s10 = int_to_ptr.vmem [resolvable:$true] %s225_s10 }
  0x14   : > { %p2479_p12 = scmp.ne.s32.totalorder %s3266_s1, %s2478_s13  ;;  %p2485_p5 = scmp.lt.u32.totalorder %s2478_s13, %s3266_s1 }
  0x15   : > { %p2834_p11 = pnand %p2352_p9, %p3272_p1 }
  0x17   : > { %p2848_p13 = pneg %p2834_p11 }
  0x19   : > { %p2481_p0 = pnand %p2848_p13, %p2479_p12 }
  0x1b   : > { %p2482_p3 = pneg %p2481_p0 }
  0x1d   : > { %p2487_p7 = pnand %p2485_p5, %p2482_p3 }
  0x1f   : > { %2490 = shalt.err (!%p2487_p7)
}
  0x20   : > { %s2491_s19 = scalar_lea.vmem %s2827_s7, 4096  ;;  %p2499_p2 = scmp.lt.s32.totalorder %s2827_s7, %s2827_s7 }
  0x21   : > { %p2492_p9 = scmp.ne.s32.totalorder %s2827_s7, %s2491_s19  ;;  %p2500_p6 = scmp.lt.s32.totalorder %s2491_s19, %s2491_s19 }
  0x23   : > { %p2494_p10 = pnand %p2492_p9, %p2848_p13  ;;  %p2501_p12 = por %p2500_p6, %p2499_p2 }
  0x25   : > { %p2495_p1 = pneg %p2494_p10 }
  0x27   : > { %p2502_p0 = pnand %p2501_p12, %p2495_p1 }
  0x29   : > { %2505 = shalt.err (!%p2502_p0)
}
  0x2a   : > { %s2730_s20 = smov 256   ;;  %s2731_s30 = smov 16  }
  0x2b   : > { %2355 = dma.hbm_to_vmem [thread:$0]  (!%p2834_p11), %s3266_s1, 4096, %s2827_s7, [#allocation6], %s2730_s20, %s2730_s20, %s2731_s30  }
  0x2c   : > { %s2506_s14 = scalar_lea.hbm %s3267_s2, 8192 }
  0x2d   : > { %p2507_p2 = scmp.ne.s32.totalorder %s3267_s2, %s2506_s14  ;;  %p2513_p10 = scmp.lt.u32.totalorder %s2506_s14, %s3267_s2 }
  0x2f   : > { %p2509_p1 = pnand %p2507_p2, %p2848_p13 }
  0x31   : > { %p2510_p6 = pneg %p2509_p1 }
  0x33   : > { %p2515_p3 = pnand %p2513_p10, %p2510_p6 }
  0x35   : > { %2518 = shalt.err (!%p2515_p3)
}
  0x36   : > { %s2519_s7 = scalar_lea.vmem %s2838_s10, 8192  ;;  %p2527_p12 = scmp.lt.s32.totalorder %s2838_s10, %s2838_s10 }
  0x37   : > { %p2520_p5 = scmp.ne.s32.totalorder %s2838_s10, %s2519_s7  ;;  %p2528_p0 = scmp.lt.s32.totalorder %s2519_s7, %s2519_s7 }
  0x39   : > { %p2522_p7 = pnand %p2520_p5, %p2848_p13  ;;  %p2529_p2 = por %p2528_p0, %p2527_p12 }
  0x3b   : > { %p2523_p9 = pneg %p2522_p7 }
  0x3d   : > { %p2530_p1 = pnand %p2529_p2, %p2523_p9 }
  0x3f   : > { %2533 = shalt.err (!%p2530_p1)
}
  0x40   : > { %s2732_s20 = smov 512   ;;  %s2733_s30 = smov 32  }
  0x41   : > { %2358 = dma.hbm_to_vmem [thread:$0]  (!%p2834_p11), %s3267_s2, 8192, %s2838_s10, [#allocation6], %s2732_s20, %s2732_s20, %s2733_s30  }
  0x42   : > { %s2734_s12 = smov [#allocation8]   ;;  %s2534_s17 = scalar_lea.hbm %s3268_s3, 8192 }
  0x43   : > { %s238_s13 = sshll.u32 %s2734_s12, 4  ;;  %p2535_p6 = scmp.ne.s32.totalorder %s3268_s3, %s2534_s17  ;;  %s239_s13 = int_to_ptr.vmem [resolvable:$true] %s238_s13 }
  0x44   : > { %p2541_p5 = scmp.lt.u32.totalorder %s2534_s17, %s3268_s3 }
  0x45   : > { %p2537_p10 = pnand %p2535_p6, %p2848_p13 }
  0x47   : > { %p2538_p3 = pneg %p2537_p10 }
  0x49   : > { %p2543_p7 = pnand %p2541_p5, %p2538_p3 }
  0x4b   : > { %2546 = shalt.err (!%p2543_p7)
}
  0x4c   : > { %s2547_s10 = scalar_lea.vmem %s239_s13, 8192  ;;  %p2555_p2 = scmp.lt.s32.totalorder %s239_s13, %s239_s13 }
  0x4d   : > { %p2548_p9 = scmp.ne.s32.totalorder %s239_s13, %s2547_s10  ;;  %p2556_p1 = scmp.lt.s32.totalorder %s2547_s10, %s2547_s10 }
  0x4f   : > { %p2550_p12 = pnand %p2548_p9, %p2848_p13  ;;  %p2557_p4 = por %p2556_p1, %p2555_p2 }
  0x51   : > { %p2551_p0 = pneg %p2550_p12 }
  0x53   : > { %p2558_p8 = pnand %p2557_p4, %p2551_p0 }
  0x55   : > { %2561 = shalt.err (!%p2558_p8)
}
  0x56   : > { %s2735_s20 = smov 128   ;;  %s2736_s26 = smov 8  }
  0x57   : > { %2361 = dma.hbm_to_vmem [thread:$0]  (!%p2834_p11), %s3268_s3, 8192, %s239_s13, [#allocation9], %s2735_s20, %s2735_s20, %s2736_s26  }
  0x58   : > { %s2914_s9 = sadd.s32 1, %s2726_s24   ;;  %s35_s12 = sadd.s32 1, %s2722_s23 }
  0x59   : > { %s32_s11 = ssub.s32 %s2726_s24, %s2914_s9  ;;  %p42_p8 = scmp.ne.s32.totalorder %s2722_s23, %s2718_s22 }
  0x5a   : > { %p33_p4 = scmp.eq.s32.totalorder %s32_s11, 0  ;;  %p43_p13 = scmp.eq.s32.totalorder %s2726_s24, 0 }
  0x5b   : > { %p2379_p6 = scmp.lt.s32.totalorder %s2726_s24, 2  ;;  %p3281_p3 = scmp.eq.s32.totalorder %s2802_s25, 1 }
  0x5c   : > { %s2924_s14 = scalar_select %p33_p4, %s2722_s23, %s35_s12  }
  0x5d   : > { %p44_p10 = por %p43_p13, %p42_p8  ;;  %p2928_p5 = por %p3281_p3, %p42_p8 }
  0x5e   : > { %s252_s15 = sand.u32 1, %s2722_s23   ;;  %s2006_s17 = sshll.u32 %s2726_s24, 11 }
  0x5f   : > { %s1920_s13 = sshll.u32 %s252_s15, 7  ;;  %s2937_s7 = scalar_lea.hbm %s3265_s0, %s2006_s17 }
  0x60   : > { %s256_s10 = scalar_lea.vmem [#allocation2], %s1920_s13  ;;  %p2939_p11 = pnand %p2379_p6, %p44_p10 }
  0x61   : > { %s263_s16 = sshll.u32 %s256_s10, 4  ;;  %s2945_s11 = scalar_lea.sflag [#allocation3], %s252_s15  ;;  %s2943_s16 = int_to_ptr.vmem [resolvable:$true] %s263_s16 }
  0x62   : > { %s2562_s12 = scalar_lea.hbm %s2937_s7, 2048  ;;  %p2564_p9 = pneg %p2939_p11 }
  0x63   : > { %p2563_p7 = scmp.ne.s32.totalorder %s2937_s7, %s2562_s12  ;;  %s2567_s18 = scalar_lea.hbm %s3265_s0, 4096 }
  0x64   : > { %p2568_p2 = scmp.lt.u32.totalorder %s2937_s7, %s3265_s0  ;;  %p2569_p1 = scmp.lt.u32.totalorder %s2567_s18, %s2562_s12 }
  0x65   : > { %p2565_p12 = pnand %p2564_p9, %p2563_p7  ;;  %p2571_p8 = scmp.lt.u32.totalorder %s2562_s12, %s2937_s7 }
  0x66   : > { %p2570_p4 = por %p2569_p1, %p2568_p2 }
  0x67   : > { %p2566_p0 = pneg %p2565_p12 }
  0x68   : > { %p2572_p13 = por %p2571_p8, %p2570_p4 }
  0x6a   : > { %p2573_p6 = pnand %p2572_p13, %p2566_p0 }
  0x6c   : > { %2576 = shalt.err (!%p2573_p6)
}
  0x6d   : > { %s2577_s15 = scalar_lea.vmem %s2943_s16, 2048  ;;  %s2737_s17 = smov [#allocation2]  }
  0x6e   : > { %p2578_p10 = scmp.ne.s32.totalorder %s2943_s16, %s2577_s15  ;;  %s2582_s13 = sshll.u32 %s2737_s17, 4  ;;  %s2583_s13 = int_to_ptr.vmem [resolvable:$false] %s2582_s13 }
  0x6f   : > { %s2584_s19 = scalar_lea.vmem %s2583_s13, 4096  ;;  %p2585_p12 = scmp.lt.s32.totalorder %s2943_s16, %s2583_s13 }
  0x70   : > { %p2580_p3 = pnand %p2578_p10, %p2564_p9  ;;  %p2586_p2 = scmp.lt.s32.totalorder %s2584_s19, %s2577_s15 }
  0x72   : > { %p2581_p7 = pneg %p2580_p3  ;;  %p2587_p1 = por %p2586_p2, %p2585_p12 }
  0x74   : > { %p2588_p4 = pnand %p2587_p1, %p2581_p7 }
  0x76   : > { %2591 = shalt.err (!%p2588_p4)
}
  0x77   : > { %2365 = dma.hbm_to_vmem [thread:$0]  (!%p2939_p11), %s2937_s7, 2048, %s2943_s16, %s2945_s11, %s2735_s20, %s2735_s20, %s2736_s26  }
  0x78   : > { %p3284_p9 = scmp.ne.s32.totalorder %s3278_s29, 0 }
  0x79   : > { %s2979_s12 = sand.u32 (!%p3284_p9), 1, %s2718_s22   ;;  %p3285_p0 = scmp.ne.s32.totalorder (!%p3284_p9), %s3276_s27, 0 }
  0x7a   : > { %275 = sbr.rel (%p3284_p9) target bundleno = 791 (0x317), region = 36  ;;  %s1924_s18 = sshll.u32 (!%p3284_p9), %s2979_s12, 7 }
  0x7b   : > { %s278_s10 = scalar_lea.sflag (!%p3284_p9), [#allocation3], %s2979_s12  ;;  %s2985_s30 = scalar_lea.vmem (!%p3284_p9), [#allocation2], %s1924_s18 }
  0x81   : > { %2693 = dma.done.wait (%p3285_p0), %s278_s10, 2048  }
  0x82   : > { %2695 = vsyncadd (%p3285_p0), %s278_s10, 4294965248  ;;  %p3286_p11 = scmp.eq.s32.totalorder %s2802_s25, 0 }
  0x84   : > { %2697 = dma.done.wait (%p3286_p11), [#allocation6], 12288   ;;  %p3287_p8 = pmov %p3286_p11 }
  0x86   : > { %2699 = vsyncadd (%p3287_p8), [#allocation6], 4294955008  ;;  %p3288_p13 = pmov %p3287_p8 }
  0x87   : > { %p3289_p6 = pmov %p3287_p8 }
  0x88   : > { %2701 = dma.done.wait (%p3288_p13), [#allocation9], 8192  }
  0x89   : > { %2703 = vsyncadd (%p3289_p6), [#allocation9], 4294959104  ;;  %v2738_v0 = vmov 0   ;;  %v2430_v1 = vld [vmem:[#allocation5 + $0x4] ss:$16 sps:$4 sm:$0xff]   ;;  %v337_v18 = vld [vmem:[%s2985_s30 + $0x8] sm:$0xff] }
  0x8a   : > { %584 = vmatprep.mubr.bf16.mxu1 %v2738_v0  ;;  %v2432_v2 = vld [vmem:[#allocation5] ss:$16 sps:$4 sm:$0xff]   ;;  %552 = vmatprep.subr.bf16.mxu1 %v2430_v1  ;;  %v2433_v3 = vld [vmem:[#allocation5 + $0x24] ss:$16 sps:$4 sm:$0xff]   ;;  %v859_v20 = vld [vmem:[#allocation8 + $0x88] sm:$0xff]  ;;  %s1928_s27 = sshll.u32 %s2979_s12, 8 }
  0x8b   : > { %553 = vmatpush1.bf16.msra.mxu1 %v2432_v2  ;;  %v2435_v4 = vld [vmem:[#allocation5 + $0x20] ss:$16 sps:$4 sm:$0xff]   ;;  %v2436_v5 = vld [vmem:[#allocation5 + $0x44] ss:$16 sps:$4 sm:$0xff]   ;;  %v843_v22 = vld [vmem:[#allocation8 + $0x8] sm:$0xff]  ;;  %s3044_s29 = scalar_lea.vmem [#allocation10], %s1928_s27 }
  0x8c   : > { %554 = vmatprep.subr.bf16.mxu1 %v2433_v3  ;;  %v2438_v6 = vld [vmem:[#allocation5 + $0x40] ss:$16 sps:$4 sm:$0xff]   ;;  %v2439_v7 = vld [vmem:[#allocation5 + $0x64] ss:$16 sps:$4 sm:$0xff]   ;;  %v2456_v23 = vld [vmem:[#allocation5 + $0xc] ss:$16 sps:$4 sm:$0xff]  }
  0x8d   : > { %v2441_v8 = vld [vmem:[#allocation5 + $0x60] ss:$16 sps:$4 sm:$0xff]   ;;  %v2442_v9 = vld [vmem:[#allocation5 + $0x84] ss:$16 sps:$4 sm:$0xff]   ;;  %v861_v27 = vld [vmem:[#allocation8 + $0x98] sm:$0xff]  ;;  %s2040_s20 = sshll.u32 %s2802_s25, 12 }
  0x8e   : > { %v2444_v10 = vld [vmem:[#allocation5 + $0x80] ss:$16 sps:$4 sm:$0xff]   ;;  %v2445_v11 = vld [vmem:[#allocation5 + $0xa4] ss:$16 sps:$4 sm:$0xff]   ;;  %v845_v30 = vld [vmem:[#allocation8 + $0x18] sm:$0xff]  ;;  %s3112_s16 = scalar_lea.hbm %s3269_s4, %s2040_s20  ;;  %s1722_s11 = sshll.u32 %s3044_s29, 4  ;;  %s3115_s11 = int_to_ptr.vmem [resolvable:$true] %s1722_s11 }
  0x8f   : > { %555 = vmatpush1.bf16.msra.mxu1 %v2435_v4  ;;  %v2447_v12 = vld [vmem:[#allocation5 + $0xa0] ss:$16 sps:$4 sm:$0xff]   ;;  %v2448_v13 = vld [vmem:[#allocation5 + $0xc4] ss:$16 sps:$4 sm:$0xff]   ;;  %v863_v33 = vld [vmem:[#allocation8 + $0xa8] sm:$0xff]  ;;  %s3119_s15 = scalar_lea.vmem [#allocation11], %s1924_s18 }
  0x90   : > { %556 = vmatprep.subr.bf16.mxu1 %v2436_v5  ;;  %v2450_v14 = vld [vmem:[#allocation5 + $0xc0] ss:$16 sps:$4 sm:$0xff]   ;;  %v2451_v15 = vld [vmem:[#allocation5 + $0xe4] ss:$16 sps:$4 sm:$0xff]   ;;  %v2454_v34 = vld [vmem:[#allocation5 + $0x8] ss:$16 sps:$4 sm:$0xff]  }
  0x91   : > { %v2453_v16 = vld [vmem:[#allocation5 + $0xe0] ss:$16 sps:$4 sm:$0xff]   ;;  %v2459_v35 = vld [vmem:[#allocation5 + $0x2c] ss:$16 sps:$4 sm:$0xff]   ;;  %v2457_v44 = vld [vmem:[#allocation5 + $0x28] ss:$16 sps:$4 sm:$0xff]  }
  0x92   : > { %v336_v17 = vld [vmem:[%s2985_s30] sm:$0xff]  ;;  %v860_v26 = vld [vmem:[#allocation8 + $0x90] sm:$0xff]  ;;  %v847_v39 = vld [vmem:[#allocation8 + $0x28] sm:$0xff]  ;;  %s1698_s17 = scalar_lea.sflag [#allocation4], %s2979_s12  ;;  %s2592_s13 = scalar_lea.vmem %s3115_s11, 4096 }
  0x93   : > { %557 = vmatpush1.bf16.msra.mxu1 %v2438_v6  ;;  %v858_v19 = vld [vmem:[#allocation8 + $0x80] sm:$0xff]  ;;  %v2206_v28 = vpack.c.bf16 %v861_v27, %v860_v26  ;;  %v844_v29 = vld [vmem:[#allocation8 + $0x10] sm:$0xff]  ;;  %v3002_v31 = vpack.c.bf16 %v337_v18, %v336_v17  ;;  %v865_v41 = vld [vmem:[#allocation8 + $0xb8] sm:$0xff]  ;;  %p2593_p10 = scmp.ne.s32.totalorder %s3115_s11, %s2592_s13  ;;  %s2739_s19 = smov [#allocation10]  }
  0x94   : > { %558 = vmatprep.subr.bf16.mxu1 %v2439_v7  ;;  %v842_v21 = vld [vmem:[#allocation8] sm:$0xff]  ;;  %v2202_v24 = vpack.c.bf16 %v859_v20, %v858_v19  ;;  %v2208_v36 = vpack.c.bf16 %v845_v30, %v844_v29  ;;  %v864_v40 = vld [vmem:[#allocation8 + $0xb0] sm:$0xff]  ;;  %v339_v43 = vld [vmem:[%s2985_s30 + $0x18] sm:$0xff]  ;;  %s2596_s10 = sshll.u32 %s2739_s19, 4  ;;  %s2597_s10 = int_to_ptr.vmem [resolvable:$false] %s2596_s10 }
  0x95   : > { %v2204_v25 = vpack.c.bf16 %v843_v22, %v842_v21  ;;  %v862_v32 = vld [vmem:[#allocation8 + $0xa0] sm:$0xff]  ;;  %v338_v42 = vld [vmem:[%s2985_s30 + $0x10] sm:$0xff]  ;;  %v2462_v45 = vld [vmem:[#allocation5 + $0x4c] ss:$16 sps:$4 sm:$0xff]   ;;  %v2214_v47 = vpack.c.bf16 %v865_v41, %v864_v40  ;;  %p2594_p3 = pnand %p2593_p10, %p2928_p5  ;;  %p2599_p12 = scmp.lt.s32.totalorder %s3115_s11, %s2597_s10 }
  0x96   : > { %2203 = vmatprep.subr.bf16.mxu0 %v2202_v24  ;;  %v2210_v37 = vpack.c.bf16 %v863_v33, %v862_v32  ;;  %v846_v38 = vld [vmem:[#allocation8 + $0x20] sm:$0xff]  ;;  %v848_v48 = vld [vmem:[#allocation8 + $0x30] sm:$0xff]  ;;  %v849_v49 = vld [vmem:[#allocation8 + $0x38] sm:$0xff]  ;;  %v3008_v50 = vpack.c.bf16 %v339_v43, %v338_v42 }
  0x97   : > { %559 = vmatpush1.bf16.msra.mxu1 %v2441_v8  ;;  %2205 = vmatpush3.bf16.msra.mxu0 %v2204_v25  ;;  %v2212_v46 = vpack.c.bf16 %v847_v39, %v846_v38  ;;  %v866_v51 = vld [vmem:[#allocation8 + $0xc0] sm:$0xff]  ;;  %v867_v52 = vld [vmem:[#allocation8 + $0xc8] sm:$0xff]  ;;  %v2216_v55 = vpack.c.bf16 %v849_v49, %v848_v48  ;;  %v868_v59 = vld [vmem:[#allocation8 + $0xd0] sm:$0xff]  ;;  %p2595_p7 = pneg %p2594_p3 }
  0x98   : > { %560 = vmatprep.subr.bf16.mxu1 %v2442_v9  ;;  %2207 = vmatprep.subr.bf16.mxu0 %v2206_v28  ;;  %v2460_v53 = vld [vmem:[#allocation5 + $0x48] ss:$16 sps:$4 sm:$0xff]   ;;  %v2465_v54 = vld [vmem:[#allocation5 + $0x6c] ss:$16 sps:$4 sm:$0xff]   ;;  %v2218_v56 = vpack.c.bf16 %v867_v52, %v866_v51  ;;  %v850_v57 = vld [vmem:[#allocation8 + $0x40] sm:$0xff] }
  0x99   : > { %v851_v58 = vld [vmem:[#allocation8 + $0x48] sm:$0xff]  ;;  %v869_v60 = vld [vmem:[#allocation8 + $0xd8] sm:$0xff]  ;;  %v340_v61 = vld [vmem:[%s2985_s30 + $0x20] sm:$0xff] }
  0x9a   : > { %v341_v62 = vld [vmem:[%s2985_s30 + $0x28] sm:$0xff]  ;;  %v2220_v2 = vpack.c.bf16 %v851_v58, %v850_v57  ;;  %v2222_v3 = vpack.c.bf16 %v869_v60, %v868_v59  ;;  %v852_v4 = vld [vmem:[#allocation8 + $0x50] sm:$0xff]  ;;  %v853_v5 = vld [vmem:[#allocation8 + $0x58] sm:$0xff] }
  0x9b   : > { %561 = vmatpush1.bf16.msra.mxu1 %v2444_v10  ;;  %2209 = vmatpush3.bf16.msra.mxu0 %v2208_v36  ;;  %v2463_v63 = vld [vmem:[#allocation5 + $0x68] ss:$16 sps:$4 sm:$0xff]   ;;  %v2468_v1 = vld [vmem:[#allocation5 + $0x8c] ss:$16 sps:$4 sm:$0xff]   ;;  %v3014_v6 = vpack.c.bf16 %v341_v62, %v340_v61  ;;  %v870_v7 = vld [vmem:[#allocation8 + $0xe0] sm:$0xff] }
  0x9c   : > { %562 = vmatprep.subr.bf16.mxu1 %v2445_v11  ;;  %2211 = vmatprep.subr.bf16.mxu0 %v2210_v37  ;;  %v871_v8 = vld [vmem:[#allocation8 + $0xe8] sm:$0xff]  ;;  %v2224_v11 = vpack.c.bf16 %v853_v5, %v852_v4  ;;  %v342_v17 = vld [vmem:[%s2985_s30 + $0x30] sm:$0xff]  ;;  %v343_v18 = vld [vmem:[%s2985_s30 + $0x38] sm:$0xff] }
  0x9d   : > { %v2466_v9 = vld [vmem:[#allocation5 + $0x88] ss:$16 sps:$4 sm:$0xff]   ;;  %v2471_v10 = vld [vmem:[#allocation5 + $0xac] ss:$16 sps:$4 sm:$0xff]   ;;  %v355_v25 = vpack.c.bf16 %v343_v18, %v342_v17  ;;  %v344_v29 = vld [vmem:[%s2985_s30 + $0x40] sm:$0xff] }
  0x9e   : > { %v2469_v19 = vld [vmem:[#allocation5 + $0xa8] ss:$16 sps:$4 sm:$0xff]   ;;  %v2474_v20 = vld [vmem:[#allocation5 + $0xcc] ss:$16 sps:$4 sm:$0xff]   ;;  %v348_v37 = vld [vmem:[%s2985_s30 + $0x60] sm:$0xff] }
  0x9f   : > { %563 = vmatpush1.bf16.msra.mxu1 %v2447_v12  ;;  %2213 = vmatpush3.bf16.msra.mxu0 %v2212_v46  ;;  %v2226_v12 = vpack.c.bf16 %v871_v8, %v870_v7  ;;  %v857_v24 = vld [vmem:[#allocation8 + $0x78] sm:$0xff]  ;;  %v345_v30 = vld [vmem:[%s2985_s30 + $0x48] sm:$0xff]  ;;  %v350_v40 = vld [vmem:[%s2985_s30 + $0x70] sm:$0xff] }
  0xa0   : > { %564 = vmatprep.subr.bf16.mxu1 %v2448_v13  ;;  %2215 = vmatprep.subr.bf16.mxu0 %v2214_v47  ;;  %v854_v13 = vld [vmem:[#allocation8 + $0x60] sm:$0xff]  ;;  %v2472_v26 = vld [vmem:[#allocation5 + $0xc8] ss:$16 sps:$4 sm:$0xff]   ;;  %v2477_v27 = vld [vmem:[#allocation5 + $0xec] ss:$16 sps:$4 sm:$0xff]   ;;  %v356_v33 = vpack.c.bf16 %v345_v30, %v344_v29 }
  0xa1   : > { %v2475_v32 = vld [vmem:[#allocation5 + $0xe8] ss:$16 sps:$4 sm:$0xff]   ;;  %v892_v48 = vld [vmem:[#allocation8 + $0x190] sm:$0xff]  ;;  %v882_v5 = vld [vmem:[#allocation8 + $0x140] sm:$0xff] }
  0xa2   : > { %v349_v38 = vld [vmem:[%s2985_s30 + $0x68] sm:$0xff]  ;;  %v351_v41 = vld [vmem:[%s2985_s30 + $0x78] sm:$0xff]  ;;  %v876_v51 = vld [vmem:[#allocation8 + $0x110] sm:$0xff] }
  0xa3   : > { %565 = vmatpush1.bf16.msra.mxu1 %v2450_v14  ;;  %2217 = vmatpush3.bf16.msra.mxu0 %v2216_v55  ;;  %v855_v14 = vld [vmem:[#allocation8 + $0x68] sm:$0xff]  ;;  %v358_v39 = vpack.c.bf16 %v349_v38, %v348_v37  ;;  %v359_v42 = vpack.c.bf16 %v351_v41, %v350_v40  ;;  %v893_v49 = vld [vmem:[#allocation8 + $0x198] sm:$0xff]  ;;  %v896_v59 = vld [vmem:[#allocation8 + $0x1b0] sm:$0xff] }
  0xa4   : > { %566 = vmatprep.subr.bf16.mxu1 %v2451_v15  ;;  %2219 = vmatprep.subr.bf16.mxu0 %v2218_v56  ;;  %v872_v15 = vld [vmem:[#allocation8 + $0xf0] sm:$0xff]  ;;  %v2228_v21 = vpack.c.bf16 %v855_v14, %v854_v13  ;;  %v891_v43 = vld [vmem:[#allocation8 + $0x188] sm:$0xff]  ;;  %v877_v52 = vld [vmem:[#allocation8 + $0x118] sm:$0xff] }
  0xa5   : > { %v875_v46 = vld [vmem:[#allocation8 + $0x108] sm:$0xff]  ;;  %v878_v56 = vld [vmem:[#allocation8 + $0x120] sm:$0xff]  ;;  %v897_v60 = vld [vmem:[#allocation8 + $0x1b8] sm:$0xff] }
  0xa6   : > { %v895_v55 = vld [vmem:[#allocation8 + $0x1a8] sm:$0xff]  ;;  %v2246_v61 = vpack.c.bf16 %v897_v60, %v896_v59  ;;  %v880_v62 = vld [vmem:[#allocation8 + $0x130] sm:$0xff]  ;;  %v902_v14 = vld [vmem:[#allocation8 + $0x1e0] sm:$0xff] }
  0xa7   : > { %567 = vmatpush1.bf16.msra.mxu1 %v2453_v16  ;;  %2221 = vmatpush3.bf16.msra.mxu0 %v2220_v2  ;;  %v873_v16 = vld [vmem:[#allocation8 + $0xf8] sm:$0xff]  ;;  %v879_v57 = vld [vmem:[#allocation8 + $0x128] sm:$0xff]  ;;  %v898_v2 = vld [vmem:[#allocation8 + $0x1c0] sm:$0xff] }
  0xa8   : > { %665 = vmatprep.subr.bf16.mxu1 %v2456_v23  ;;  %2223 = vmatprep.subr.bf16.mxu0 %v2222_v3  ;;  %v2230_v22 = vpack.c.bf16 %v873_v16, %v872_v15  ;;  %v856_v23 = vld [vmem:[#allocation8 + $0x70] sm:$0xff]  ;;  %v2244_v58 = vpack.c.bf16 %v879_v57, %v878_v56  ;;  %v899_v3 = vld [vmem:[#allocation8 + $0x1c8] sm:$0xff]  ;;  %v886_v17 = vld [vmem:[#allocation8 + $0x160] sm:$0xff] }
  0xa9   : > { %v2232_v28 = vpack.c.bf16 %v857_v24, %v856_v23  ;;  %v2250_v4 = vpack.c.bf16 %v899_v3, %v898_v2  ;;  %v900_v8 = vld [vmem:[#allocation8 + $0x1d0] sm:$0xff]  ;;  %v903_v15 = vld [vmem:[#allocation8 + $0x1e8] sm:$0xff]  ;;  %v889_v24 = vld [vmem:[#allocation8 + $0x178] sm:$0xff] }
  0xaa   : > { %585 = vmatmul.mubr.bf16.vlgmr.msra.gmra.mrb[0].mxu1 %v3002_v31  ;;  %v2258_v16 = vpack.c.bf16 %v903_v15, %v902_v14  ;;  %v887_v18 = vld [vmem:[#allocation8 + $0x168] sm:$0xff]  ;;  %v888_v23 = vld [vmem:[#allocation8 + $0x170] sm:$0xff] }
  0xab   : > { %666 = vmatpush1.bf16.msra.mxu1 %v2454_v34  ;;  %594 = vmatprep.mubr.bf16.mxu1 %v2738_v0  ;;  %v346_v34 = vld [vmem:[%s2985_s30 + $0x50] sm:$0xff] }
  0xac   : > { %667 = vmatprep.subr.bf16.mxu1 %v2459_v35  ;;  %2225 = vmatpush3.bf16.msra.mxu0 %v2224_v11  ;;  %v347_v35 = vld [vmem:[%s2985_s30 + $0x58] sm:$0xff]  ;;  %v884_v11 = vld [vmem:[#allocation8 + $0x150] sm:$0xff]  ;;  %s2598_s30 = scalar_lea.vmem %s2597_s10, 8192 }
  0xad   : > { %2227 = vmatprep.subr.bf16.mxu0 %v2226_v12  ;;  %v357_v36 = vpack.c.bf16 %v347_v35, %v346_v34  ;;  %v885_v12 = vld [vmem:[#allocation8 + $0x158] sm:$0xff]  ;;  %p2600_p2 = scmp.lt.s32.totalorder %s2598_s30, %s2592_s13 }
  0xae   : > { %v2256_v13 = vpack.c.bf16 %v885_v12, %v884_v11 }
  0xaf   : > { %668 = vmatpush1.bf16.msra.mxu1 %v2457_v44  ;;  %p2601_p1 = por %p2600_p2, %p2599_p12 }
  0xb0   : > { %669 = vmatprep.subr.bf16.mxu1 %v2462_v45  ;;  %2229 = vmatpush3.bf16.msra.mxu0 %v2228_v21  ;;  %v874_v45 = vld [vmem:[#allocation8 + $0x100] sm:$0xff]  ;;  %v905_v21 = vld [vmem:[#allocation8 + $0x1f8] sm:$0xff] }
  0xb1   : > { %2231 = vmatprep.subr.bf16.mxu0 %v2230_v22  ;;  %v2236_v47 = vpack.c.bf16 %v875_v46, %v874_v45  ;;  %p2602_p4 = pnand %p2601_p1, %p2595_p7 }
  0xb2   : > { %595 = vmatmul.mubr.bf16.gmra.mrb[4].mxu1 %v3008_v50 }
  0xb3   : > { %604 = vmatprep.mubr.bf16.mxu1 %v2738_v0  ;;  %670 = vmatpush1.bf16.msra.mxu1 %v2460_v53  ;;  %v2240_v53 = vpack.c.bf16 %v877_v52, %v876_v51 }
  0xb4   : > { %671 = vmatprep.subr.bf16.mxu1 %v2465_v54  ;;  %2233 = vmatpush3.bf16.msra.mxu0 %v2232_v28  ;;  %v894_v54 = vld [vmem:[#allocation8 + $0x1a0] sm:$0xff] }
  0xb7   : > { %672 = vmatpush1.bf16.msra.mxu1 %v2463_v63  ;;  %v881_v63 = vld [vmem:[#allocation8 + $0x138] sm:$0xff] }
  0xb8   : > { %673 = vmatprep.subr.bf16.mxu1 %v2468_v1  ;;  %v2248_v1 = vpack.c.bf16 %v881_v63, %v880_v62 }
  0xba   : > { %605 = vmatmul.mubr.bf16.gmra.mrb[8].mxu1 %v3014_v6 }
  0xbb   : > { %614 = vmatprep.mubr.bf16.mxu1 %v2738_v0  ;;  %674 = vmatpush1.bf16.msra.mxu1 %v2466_v9  ;;  %v901_v9 = vld [vmem:[#allocation8 + $0x1d8] sm:$0xff] }
  0xbc   : > { %675 = vmatprep.subr.bf16.mxu1 %v2471_v10  ;;  %v2254_v10 = vpack.c.bf16 %v901_v9, %v900_v8 }
  0xbf   : > { %676 = vmatpush1.bf16.msra.mxu1 %v2469_v19  ;;  %v2260_v19 = vpack.c.bf16 %v887_v18, %v886_v17 }
  0xc0   : > { %677 = vmatprep.subr.bf16.mxu1 %v2474_v20  ;;  %v904_v20 = vld [vmem:[#allocation8 + $0x1f0] sm:$0xff] }
  0xc1   : > { %v2262_v22 = vpack.c.bf16 %v905_v21, %v904_v20 }
  0xc2   : > { %615 = vmatmul.mubr.bf16.gmra.mrb[12].mxu1 %v355_v25 }
  0xc3   : > { %624 = vmatprep.mubr.bf16.mxu1 %v2738_v0  ;;  %678 = vmatpush1.bf16.msra.mxu1 %v2472_v26 }
  0xc4   : > { %679 = vmatprep.subr.bf16.mxu1 %v2477_v27 }
  0xc7   : > { %680 = vmatpush1.bf16.msra.mxu1 %v2475_v32 }
  0xca   : > { %625 = vmatmul.mubr.bf16.gmra.mrb[16].mxu1 %v356_v33 }
  0xcb   : > { %634 = vmatprep.mubr.bf16.mxu1 %v2738_v0 }
  0xd2   : > { %635 = vmatmul.mubr.bf16.gmra.mrb[20].mxu1 %v357_v36 }
  0xd3   : > { %644 = vmatprep.mubr.bf16.mxu1 %v2738_v0 }
  0xda   : > { %645 = vmatmul.mubr.bf16.gmra.mrb[24].mxu1 %v358_v39 }
  0xdb   : > { %654 = vmatprep.mubr.bf16.mxu1 %v2738_v0 }
  0xe2   : > { %655 = vmatmul.mubr.bf16.gmra.mrb[28].mxu1 %v359_v42 }
  0xe3   : > { %697 = vmatprep.mubr.bf16.mxu1 %v2738_v0 }
  0xea   : > { %698 = vmatmul.mubr.bf16.vlgmr.msra.gmra.mrb[32].mxu1 %v3002_v31  ;;  %v890_v31 = vld [vmem:[#allocation8 + $0x180] sm:$0xff] }
  0xeb   : > { %707 = vmatprep.mubr.bf16.mxu1 %v2738_v0  ;;  %v2234_v44 = vpack.c.bf16 %v891_v43, %v890_v31 }
  0xed   : > { %2235 = vmatprep.subr.bf16.mxu1 %v2234_v44 }
  0xee   : > { %2237 = vmatpush3.bf16.msra.mxu1 %v2236_v47 }
  0xf2   : > { %708 = vmatmul.mubr.bf16.gmra.mrb[36].mxu1 %v3008_v50  ;;  %v2238_v50 = vpack.c.bf16 %v893_v49, %v892_v48 }
  0xf3   : > { %717 = vmatprep.mubr.bf16.mxu1 %v2738_v0 }
  0xf4   : > { %2239 = vmatprep.subr.bf16.mxu1 %v2238_v50 }
  0xf5   : > { %2241 = vmatpush3.bf16.msra.mxu1 %v2240_v53 }
  0xfa   : > { %718 = vmatmul.mubr.bf16.gmra.mrb[40].mxu1 %v3014_v6  ;;  %v883_v6 = vld [vmem:[#allocation8 + $0x148] sm:$0xff] }
  0xfb   : > { %727 = vmatprep.mubr.bf16.mxu1 %v2738_v0  ;;  %v2252_v7 = vpack.c.bf16 %v883_v6, %v882_v5 }
 0x102   : > { %728 = vmatmul.mubr.bf16.gmra.mrb[44].mxu1 %v355_v25  ;;  %v2264_v25 = vpack.c.bf16 %v889_v24, %v888_v23 }
 0x103   : > { %737 = vmatprep.mubr.bf16.mxu1 %v2738_v0 }
 0x10a   : > { %738 = vmatmul.mubr.bf16.gmra.mrb[48].mxu1 %v356_v33 }
 0x10b   : > { %747 = vmatprep.mubr.bf16.mxu1 %v2738_v0 }
 0x112   : > { %748 = vmatmul.mubr.bf16.gmra.mrb[52].mxu1 %v357_v36 }
 0x113   : > { %757 = vmatprep.mubr.bf16.mxu1 %v2738_v0 }
 0x11a   : > { %758 = vmatmul.mubr.bf16.gmra.mrb[56].mxu1 %v358_v39 }
 0x11b   : > { %767 = vmatprep.mubr.bf16.mxu1 %v2738_v0  ;;  %v2242_v0 = vpack.c.bf16 %v895_v55, %v894_v54 }
 0x11d   : > { %2243 = vmatprep.subr.bf16.mxu1 %v2242_v0 }
 0x11e   : > { %2245 = vmatpush3.bf16.msra.mxu1 %v2244_v58 }
 0x11f   : > { %2247 = vmatprep.subr.bf16.mxu1 %v2246_v61 }
 0x122   : > { %768 = vmatmul.mubr.bf16.gmra.mrb[60].mxu1 %v359_v42 }
 0x123   : > { %2249 = vmatpush3.bf16.msra.mxu1 %v2248_v1 }
 0x124   : > { %2251 = vmatprep.subr.bf16.mxu1 %v2250_v4 }
 0x127   : > { %2253 = vmatpush3.bf16.msra.mxu1 %v2252_v7 }
 0x128   : > { %2255 = vmatprep.subr.bf16.mxu1 %v2254_v10 }
 0x12b   : > { %2257 = vmatpush3.bf16.msra.mxu1 %v2256_v13 }
 0x12c   : > { %2259 = vmatprep.subr.bf16.mxu1 %v2258_v16 }
 0x12f   : > { %2261 = vmatpush3.bf16.msra.mxu1 %v2260_v19 }
 0x130   : > { %2263 = vmatprep.subr.bf16.mxu1 %v2262_v22 }
 0x133   : > { %2265 = vmatpush3.bf16.msra.mxu1 %v2264_v25 }
 0x17d   : > { %v586_v26 = vpop.f32.mrb[0].mxu1 }
 0x17e   : > { %v588_v27 = vpop.f32.mrb[1].mxu1 }
 0x17f   : > { %v2007_v28 = vpack.c.bf16 %v588_v27, %v586_v26  ;;  %v590_v29 = vpop.f32.mrb[2].mxu1  ;;  %1194 = vmatprep.mubr.f32.mxu0 %v588_v27 }
 0x180   : > { %v2268_v30 = vpack.c.bf16 %v590_v29, %v586_v26  ;;  %v592_v32 = vpop.f32.mrb[3].mxu1  ;;  %1195 = vmatmul.mubr.f32.vlgmr.msra.gmra.mrb[0].mxu0 %v586_v26  ;;  %v779_v26 = vld [vmem:[#allocation7 + $0x8] sm:$0xff] }
 0x181   : > { %1098 = vst [vmem:[%s3044_s29] sm:$0xff] %v2007_v28  ;;  %v2009_v33 = vpack.c.bf16 %v592_v32, %v590_v29  ;;  %v2266_v34 = vpack.c.bf16 %v592_v32, %v588_v27  ;;  %1199 = vmatprep.mubr.f32.mxu0 %v592_v32 }
 0x183   : > { %1100 = vst [vmem:[%s3044_s29 + $0x10] sm:$0xff] %v2009_v33  ;;  %2267 = vmatprep.subr.bf16.mxu0 %v2266_v34 }
 0x184   : > { %1200 = vmatmul.mubr.f32.gmra.mrb[2].mxu0 %v590_v29 }
 0x185   : > { %2269 = vmatpush1.bf16.xpose.msra.mxu0 %v2268_v30  ;;  %v596_v35 = vpop.f32.mrb[4].mxu1 }
 0x186   : > { %v598_v36 = vpop.f32.mrb[5].mxu1 }
 0x187   : > { %v2011_v37 = vpack.c.bf16 %v598_v36, %v596_v35  ;;  %v600_v38 = vpop.f32.mrb[6].mxu1  ;;  %1204 = vmatprep.mubr.f32.mxu0 %v598_v36 }
 0x188   : > { %v2272_v39 = vpack.c.bf16 %v600_v38, %v596_v35  ;;  %v602_v40 = vpop.f32.mrb[7].mxu1  ;;  %1205 = vmatmul.mubr.f32.gmra.mrb[4].mxu0 %v596_v35 }
 0x189   : > { %1102 = vst [vmem:[%s3044_s29 + $0x20] sm:$0xff] %v2011_v37  ;;  %v2013_v41 = vpack.c.bf16 %v602_v40, %v600_v38  ;;  %v2270_v42 = vpack.c.bf16 %v602_v40, %v598_v36  ;;  %1209 = vmatprep.mubr.f32.mxu0 %v602_v40  ;;  %v778_v36 = vld [vmem:[#allocation7] sm:$0xff]  ;;  %v783_v37 = vld [vmem:[#allocation7 + $0x28] sm:$0xff] }
 0x18b   : > { %1104 = vst [vmem:[%s3044_s29 + $0x30] sm:$0xff] %v2013_v41  ;;  %2271 = vmatprep.subr.bf16.mxu0 %v2270_v42  ;;  %v787_v41 = vld [vmem:[#allocation7 + $0x48] sm:$0xff] }
 0x18c   : > { %1210 = vmatmul.mubr.f32.gmra.mrb[6].mxu0 %v600_v38 }
 0x18d   : > { %2273 = vmatpush1.bf16.xpose.msra.mxu0 %v2272_v39  ;;  %v606_v31 = vpop.f32.mrb[8].mxu1  ;;  %v782_v39 = vld [vmem:[#allocation7 + $0x20] sm:$0xff] }
 0x18e   : > { %v608_v43 = vpop.f32.mrb[9].mxu1 }
 0x18f   : > { %v2015_v44 = vpack.c.bf16 %v608_v43, %v606_v31  ;;  %v610_v45 = vpop.f32.mrb[10].mxu1  ;;  %1214 = vmatprep.mubr.f32.mxu0 %v608_v43 }
 0x190   : > { %v2276_v46 = vpack.c.bf16 %v610_v45, %v606_v31  ;;  %v612_v47 = vpop.f32.mrb[11].mxu1  ;;  %1215 = vmatmul.mubr.f32.gmra.mrb[8].mxu0 %v606_v31 }
 0x191   : > { %1106 = vst [vmem:[%s3044_s29 + $0x40] sm:$0xff] %v2015_v44  ;;  %v2017_v48 = vpack.c.bf16 %v612_v47, %v610_v45  ;;  %v2274_v49 = vpack.c.bf16 %v612_v47, %v608_v43  ;;  %1219 = vmatprep.mubr.f32.mxu0 %v612_v47  ;;  %v786_v47 = vld [vmem:[#allocation7 + $0x40] sm:$0xff] }
 0x193   : > { %1108 = vst [vmem:[%s3044_s29 + $0x50] sm:$0xff] %v2017_v48  ;;  %2275 = vmatprep.subr.bf16.mxu0 %v2274_v49  ;;  %v791_v48 = vld [vmem:[#allocation7 + $0x68] sm:$0xff] }
 0x194   : > { %1220 = vmatmul.mubr.f32.gmra.mrb[10].mxu0 %v610_v45 }
 0x195   : > { %2277 = vmatpush1.bf16.xpose.msra.mxu0 %v2276_v46  ;;  %v616_v50 = vpop.f32.mrb[12].mxu1 }
 0x196   : > { %v618_v51 = vpop.f32.mrb[13].mxu1 }
 0x197   : > { %v2019_v52 = vpack.c.bf16 %v618_v51, %v616_v50  ;;  %v620_v53 = vpop.f32.mrb[14].mxu1  ;;  %1224 = vmatprep.mubr.f32.mxu0 %v618_v51 }
 0x198   : > { %v2280_v54 = vpack.c.bf16 %v620_v53, %v616_v50  ;;  %v622_v55 = vpop.f32.mrb[15].mxu1  ;;  %1225 = vmatmul.mubr.f32.gmra.mrb[12].mxu0 %v616_v50  ;;  %v790_v50 = vld [vmem:[#allocation7 + $0x60] sm:$0xff] }
 0x199   : > { %1110 = vst [vmem:[%s3044_s29 + $0x60] sm:$0xff] %v2019_v52  ;;  %v2021_v0 = vpack.c.bf16 %v622_v55, %v620_v53  ;;  %v2278_v56 = vpack.c.bf16 %v622_v55, %v618_v51  ;;  %1229 = vmatprep.mubr.f32.mxu0 %v622_v55  ;;  %v795_v52 = vld [vmem:[#allocation7 + $0x88] sm:$0xff] }
 0x19b   : > { %1112 = vst [vmem:[%s3044_s29 + $0x70] sm:$0xff] %v2021_v0  ;;  %2279 = vmatprep.subr.bf16.mxu0 %v2278_v56 }
 0x19c   : > { %1230 = vmatmul.mubr.f32.gmra.mrb[14].mxu0 %v620_v53 }
 0x19d   : > { %2281 = vmatpush1.bf16.xpose.msra.mxu0 %v2280_v54  ;;  %v626_v57 = vpop.f32.mrb[16].mxu1 }
 0x19e   : > { %v628_v58 = vpop.f32.mrb[17].mxu1 }
 0x19f   : > { %v2023_v59 = vpack.c.bf16 %v628_v58, %v626_v57  ;;  %v630_v60 = vpop.f32.mrb[18].mxu1  ;;  %1234 = vmatprep.mubr.f32.mxu0 %v628_v58 }
 0x1a0   : > { %v2284_v61 = vpack.c.bf16 %v630_v60, %v626_v57  ;;  %v632_v62 = vpop.f32.mrb[19].mxu1  ;;  %1235 = vmatmul.mubr.f32.gmra.mrb[16].mxu0 %v626_v57 }
 0x1a1   : > { %1114 = vst [vmem:[%s3044_s29 + $0x80] sm:$0xff] %v2023_v59  ;;  %v2025_v63 = vpack.c.bf16 %v632_v62, %v630_v60  ;;  %v2282_v1 = vpack.c.bf16 %v632_v62, %v628_v58  ;;  %1239 = vmatprep.mubr.f32.mxu0 %v632_v62  ;;  %v794_v58 = vld [vmem:[#allocation7 + $0x80] sm:$0xff]  ;;  %v799_v59 = vld [vmem:[#allocation7 + $0xa8] sm:$0xff] }
 0x1a3   : > { %1116 = vst [vmem:[%s3044_s29 + $0x90] sm:$0xff] %v2025_v63  ;;  %2283 = vmatprep.subr.bf16.mxu0 %v2282_v1  ;;  %v803_v63 = vld [vmem:[#allocation7 + $0xc8] sm:$0xff] }
 0x1a4   : > { %1240 = vmatmul.mubr.f32.gmra.mrb[18].mxu0 %v630_v60 }
 0x1a5   : > { %2285 = vmatpush1.bf16.xpose.msra.mxu0 %v2284_v61  ;;  %v636_v2 = vpop.f32.mrb[20].mxu1  ;;  %v798_v61 = vld [vmem:[#allocation7 + $0xa0] sm:$0xff] }
 0x1a6   : > { %v638_v3 = vpop.f32.mrb[21].mxu1 }
 0x1a7   : > { %v2027_v4 = vpack.c.bf16 %v638_v3, %v636_v2  ;;  %v640_v5 = vpop.f32.mrb[22].mxu1  ;;  %1244 = vmatprep.mubr.f32.mxu0 %v638_v3 }
 0x1a8   : > { %v2288_v6 = vpack.c.bf16 %v640_v5, %v636_v2  ;;  %v642_v7 = vpop.f32.mrb[23].mxu1  ;;  %1245 = vmatmul.mubr.f32.gmra.mrb[20].mxu0 %v636_v2 }
 0x1a9   : > { %1118 = vst [vmem:[%s3044_s29 + $0xa0] sm:$0xff] %v2027_v4  ;;  %v2029_v8 = vpack.c.bf16 %v642_v7, %v640_v5  ;;  %v2286_v9 = vpack.c.bf16 %v642_v7, %v638_v3  ;;  %1249 = vmatprep.mubr.f32.mxu0 %v642_v7  ;;  %v802_v7 = vld [vmem:[#allocation7 + $0xc0] sm:$0xff] }
 0x1ab   : > { %1120 = vst [vmem:[%s3044_s29 + $0xb0] sm:$0xff] %v2029_v8  ;;  %2287 = vmatprep.subr.bf16.mxu0 %v2286_v9  ;;  %v807_v8 = vld [vmem:[#allocation7 + $0xe8] sm:$0xff] }
 0x1ac   : > { %1250 = vmatmul.mubr.f32.gmra.mrb[22].mxu0 %v640_v5 }
 0x1ad   : > { %2289 = vmatpush1.bf16.xpose.msra.mxu0 %v2288_v6  ;;  %v646_v10 = vpop.f32.mrb[24].mxu1 }
 0x1ae   : > { %v648_v11 = vpop.f32.mrb[25].mxu1 }
 0x1af   : > { %v2031_v12 = vpack.c.bf16 %v648_v11, %v646_v10  ;;  %v650_v13 = vpop.f32.mrb[26].mxu1  ;;  %1254 = vmatprep.mubr.f32.mxu0 %v648_v11 }
 0x1b0   : > { %v2292_v14 = vpack.c.bf16 %v650_v13, %v646_v10  ;;  %v652_v15 = vpop.f32.mrb[27].mxu1  ;;  %1255 = vmatmul.mubr.f32.gmra.mrb[24].mxu0 %v646_v10  ;;  %v806_v10 = vld [vmem:[#allocation7 + $0xe0] sm:$0xff] }
 0x1b1   : > { %1122 = vst [vmem:[%s3044_s29 + $0xc0] sm:$0xff] %v2031_v12  ;;  %v2033_v16 = vpack.c.bf16 %v652_v15, %v650_v13  ;;  %v2290_v17 = vpack.c.bf16 %v652_v15, %v648_v11  ;;  %1259 = vmatprep.mubr.f32.mxu0 %v652_v15  ;;  %v811_v12 = vld [vmem:[#allocation7 + $0x108] sm:$0xff] }
 0x1b3   : > { %1124 = vst [vmem:[%s3044_s29 + $0xd0] sm:$0xff] %v2033_v16  ;;  %2291 = vmatprep.subr.bf16.mxu0 %v2290_v17 }
 0x1b4   : > { %1260 = vmatmul.mubr.f32.gmra.mrb[26].mxu0 %v650_v13 }
 0x1b5   : > { %2293 = vmatpush1.bf16.xpose.msra.mxu0 %v2292_v14  ;;  %v656_v18 = vpop.f32.mrb[28].mxu1 }
 0x1b6   : > { %v658_v19 = vpop.f32.mrb[29].mxu1 }
 0x1b7   : > { %v2035_v20 = vpack.c.bf16 %v658_v19, %v656_v18  ;;  %v660_v21 = vpop.f32.mrb[30].mxu1  ;;  %1264 = vmatprep.mubr.f32.mxu0 %v658_v19 }
 0x1b8   : > { %v2296_v22 = vpack.c.bf16 %v660_v21, %v656_v18  ;;  %v662_v23 = vpop.f32.mrb[31].mxu1  ;;  %1265 = vmatmul.mubr.f32.gmra.mrb[28].mxu0 %v656_v18 }
 0x1b9   : > { %1126 = vst [vmem:[%s3044_s29 + $0xe0] sm:$0xff] %v2035_v20  ;;  %v2037_v24 = vpack.c.bf16 %v662_v23, %v660_v21  ;;  %v2294_v25 = vpack.c.bf16 %v662_v23, %v658_v19  ;;  %1269 = vmatprep.mubr.f32.mxu0 %v662_v23  ;;  %v810_v19 = vld [vmem:[#allocation7 + $0x100] sm:$0xff]  ;;  %v815_v20 = vld [vmem:[#allocation7 + $0x128] sm:$0xff] }
 0x1bb   : > { %1128 = vst [vmem:[%s3044_s29 + $0xf0] sm:$0xff] %v2037_v24  ;;  %2295 = vmatprep.subr.bf16.mxu0 %v2294_v25  ;;  %v819_v24 = vld [vmem:[#allocation7 + $0x148] sm:$0xff] }
 0x1bc   : > { %1270 = vmatmul.mubr.f32.gmra.mrb[30].mxu0 %v660_v21 }
 0x1bd   : > { %2297 = vmatpush1.bf16.xpose.msra.mxu0 %v2296_v22  ;;  %v699_v27 = vpop.f32.mrb[32].mxu1  ;;  %1500 = vmatprep.mubr.f32.mxu0 %v779_v26  ;;  %v814_v22 = vld [vmem:[#allocation7 + $0x120] sm:$0xff] }
 0x1be   : > { %v701_v28 = vpop.f32.mrb[33].mxu1 }
 0x1bf   : > { %v2008_v29 = vpack.c.bf16 %v701_v28, %v699_v27  ;;  %v703_v30 = vpop.f32.mrb[34].mxu1  ;;  %1339 = vmatprep.mubr.f32.mxu1 %v701_v28 }
 0x1c0   : > { %v2300_v32 = vpack.c.bf16 %v703_v30, %v699_v27  ;;  %v705_v33 = vpop.f32.mrb[35].mxu1  ;;  %1340 = vmatmul.mubr.f32.vlgmr.msra.gmra.mrb[64].mxu1 %v699_v27 }
 0x1c1   : > { %1099 = vst [vmem:[%s3044_s29 + $0x8] sm:$0xff] %v2008_v29  ;;  %v2010_v34 = vpack.c.bf16 %v705_v33, %v703_v30  ;;  %v2298_v35 = vpack.c.bf16 %v705_v33, %v701_v28  ;;  %1344 = vmatprep.mubr.f32.mxu1 %v705_v33  ;;  %v823_v33 = vld [vmem:[#allocation7 + $0x168] sm:$0xff] }
 0x1c3   : > { %1101 = vst [vmem:[%s3044_s29 + $0x18] sm:$0xff] %v2010_v34  ;;  %2299 = vmatprep.subr.bf16.mxu0 %v2298_v35  ;;  %v822_v35 = vld [vmem:[#allocation7 + $0x160] sm:$0xff] }
 0x1c4   : > { %1501 = vmatmul.mubr.f32.vlgmr.msra.gmra.mrb[32].mxu0 %v778_v36  ;;  %1345 = vmatmul.mubr.f32.gmra.mrb[66].mxu1 %v703_v30 }
 0x1c5   : > { %2301 = vmatpush1.bf16.xpose.msra.mxu0 %v2300_v32  ;;  %v709_v38 = vpop.f32.mrb[36].mxu1  ;;  %1505 = vmatprep.mubr.f32.mxu0 %v783_v37  ;;  %v818_v32 = vld [vmem:[#allocation7 + $0x140] sm:$0xff]  ;;  %v827_v37 = vld [vmem:[#allocation7 + $0x188] sm:$0xff] }
 0x1c6   : > { %v711_v40 = vpop.f32.mrb[37].mxu1 }
 0x1c7   : > { %v2012_v42 = vpack.c.bf16 %v711_v40, %v709_v38  ;;  %v713_v31 = vpop.f32.mrb[38].mxu1  ;;  %1349 = vmatprep.mubr.f32.mxu1 %v711_v40 }
 0x1c8   : > { %v2304_v43 = vpack.c.bf16 %v713_v31, %v709_v38  ;;  %1506 = vmatmul.mubr.f32.gmra.mrb[34].mxu0 %v782_v39  ;;  %v715_v44 = vpop.f32.mrb[39].mxu1  ;;  %1350 = vmatmul.mubr.f32.gmra.mrb[68].mxu1 %v709_v38 }
 0x1c9   : > { %1103 = vst [vmem:[%s3044_s29 + $0x28] sm:$0xff] %v2012_v42  ;;  %v2014_v45 = vpack.c.bf16 %v715_v44, %v713_v31  ;;  %v2302_v46 = vpack.c.bf16 %v715_v44, %v711_v40  ;;  %1354 = vmatprep.mubr.f32.mxu1 %v715_v44  ;;  %1509 = vmatprep.mubr.f32.mxu0 %v787_v41  ;;  %v831_v44 = vld [vmem:[#allocation7 + $0x1a8] sm:$0xff] }
 0x1cb   : > { %1105 = vst [vmem:[%s3044_s29 + $0x38] sm:$0xff] %v2014_v45  ;;  %2303 = vmatprep.subr.bf16.mxu0 %v2302_v46  ;;  %v830_v46 = vld [vmem:[#allocation7 + $0x1a0] sm:$0xff] }
 0x1cc   : > { %1510 = vmatmul.mubr.f32.gmra.mrb[36].mxu0 %v786_v47  ;;  %1355 = vmatmul.mubr.f32.gmra.mrb[70].mxu1 %v713_v31 }
 0x1cd   : > { %2305 = vmatpush1.bf16.xpose.msra.mxu0 %v2304_v43  ;;  %v719_v49 = vpop.f32.mrb[40].mxu1  ;;  %1513 = vmatprep.mubr.f32.mxu0 %v791_v48  ;;  %v826_v43 = vld [vmem:[#allocation7 + $0x180] sm:$0xff]  ;;  %v835_v48 = vld [vmem:[#allocation7 + $0x1c8] sm:$0xff] }
 0x1ce   : > { %v721_v51 = vpop.f32.mrb[41].mxu1 }
 0x1cf   : > { %v2016_v53 = vpack.c.bf16 %v721_v51, %v719_v49  ;;  %v723_v54 = vpop.f32.mrb[42].mxu1  ;;  %1359 = vmatprep.mubr.f32.mxu1 %v721_v51 }
 0x1d0   : > { %v2308_v55 = vpack.c.bf16 %v723_v54, %v719_v49  ;;  %1514 = vmatmul.mubr.f32.gmra.mrb[38].mxu0 %v790_v50  ;;  %v725_v0 = vpop.f32.mrb[43].mxu1  ;;  %1360 = vmatmul.mubr.f32.gmra.mrb[72].mxu1 %v719_v49 }
 0x1d1   : > { %1107 = vst [vmem:[%s3044_s29 + $0x48] sm:$0xff] %v2016_v53  ;;  %v2018_v56 = vpack.c.bf16 %v725_v0, %v723_v54  ;;  %v2306_v57 = vpack.c.bf16 %v725_v0, %v721_v51  ;;  %1364 = vmatprep.mubr.f32.mxu1 %v725_v0  ;;  %1517 = vmatprep.mubr.f32.mxu0 %v795_v52  ;;  %v839_v0 = vld [vmem:[#allocation7 + $0x1e8] sm:$0xff] }
 0x1d3   : > { %1109 = vst [vmem:[%s3044_s29 + $0x58] sm:$0xff] %v2018_v56  ;;  %2307 = vmatprep.subr.bf16.mxu0 %v2306_v57  ;;  %v838_v56 = vld [vmem:[#allocation7 + $0x1e0] sm:$0xff]  ;;  %v781_v57 = vld [vmem:[#allocation7 + $0x18] sm:$0xff] }
 0x1d4   : > { %1518 = vmatmul.mubr.f32.gmra.mrb[40].mxu0 %v794_v58  ;;  %1365 = vmatmul.mubr.f32.gmra.mrb[74].mxu1 %v723_v54  ;;  %v780_v58 = vld [vmem:[#allocation7 + $0x10] sm:$0xff] }
 0x1d5   : > { %2309 = vmatpush1.bf16.xpose.msra.mxu0 %v2308_v55  ;;  %v729_v60 = vpop.f32.mrb[44].mxu1  ;;  %1521 = vmatprep.mubr.f32.mxu0 %v799_v59  ;;  %v834_v55 = vld [vmem:[#allocation7 + $0x1c0] sm:$0xff]  ;;  %v785_v59 = vld [vmem:[#allocation7 + $0x38] sm:$0xff] }
 0x1d6   : > { %v731_v62 = vpop.f32.mrb[45].mxu1 }
 0x1d7   : > { %v2020_v1 = vpack.c.bf16 %v731_v62, %v729_v60  ;;  %v733_v2 = vpop.f32.mrb[46].mxu1  ;;  %1369 = vmatprep.mubr.f32.mxu1 %v731_v62 }
 0x1d8   : > { %v2312_v3 = vpack.c.bf16 %v733_v2, %v729_v60  ;;  %1522 = vmatmul.mubr.f32.gmra.mrb[42].mxu0 %v798_v61  ;;  %v735_v4 = vpop.f32.mrb[47].mxu1  ;;  %1370 = vmatmul.mubr.f32.gmra.mrb[76].mxu1 %v729_v60  ;;  %v784_v60 = vld [vmem:[#allocation7 + $0x30] sm:$0xff]  ;;  %v789_v61 = vld [vmem:[#allocation7 + $0x58] sm:$0xff] }
 0x1d9   : > { %1111 = vst [vmem:[%s3044_s29 + $0x68] sm:$0xff] %v2020_v1  ;;  %v2022_v5 = vpack.c.bf16 %v735_v4, %v733_v2  ;;  %v2310_v6 = vpack.c.bf16 %v735_v4, %v731_v62  ;;  %1374 = vmatprep.mubr.f32.mxu1 %v735_v4  ;;  %1525 = vmatprep.mubr.f32.mxu0 %v803_v63  ;;  %v788_v62 = vld [vmem:[#allocation7 + $0x50] sm:$0xff]  ;;  %v793_v63 = vld [vmem:[#allocation7 + $0x78] sm:$0xff] }
 0x1da   : > { %v792_v1 = vld [vmem:[#allocation7 + $0x70] sm:$0xff]  ;;  %v801_v4 = vld [vmem:[#allocation7 + $0xb8] sm:$0xff] }
 0x1db   : > { %1113 = vst [vmem:[%s3044_s29 + $0x78] sm:$0xff] %v2022_v5  ;;  %2311 = vmatprep.subr.bf16.mxu0 %v2310_v6  ;;  %v800_v5 = vld [vmem:[#allocation7 + $0xb0] sm:$0xff]  ;;  %v805_v6 = vld [vmem:[#allocation7 + $0xd8] sm:$0xff] }
 0x1dc   : > { %1526 = vmatmul.mubr.f32.gmra.mrb[44].mxu0 %v802_v7  ;;  %1375 = vmatmul.mubr.f32.gmra.mrb[78].mxu1 %v733_v2  ;;  %v797_v2 = vld [vmem:[#allocation7 + $0x98] sm:$0xff]  ;;  %v804_v7 = vld [vmem:[#allocation7 + $0xd0] sm:$0xff] }
 0x1dd   : > { %2313 = vmatpush1.bf16.xpose.msra.mxu0 %v2312_v3  ;;  %v739_v9 = vpop.f32.mrb[48].mxu1  ;;  %1529 = vmatprep.mubr.f32.mxu0 %v807_v8  ;;  %v796_v3 = vld [vmem:[#allocation7 + $0x90] sm:$0xff]  ;;  %v809_v8 = vld [vmem:[#allocation7 + $0xf8] sm:$0xff] }
 0x1de   : > { %v741_v11 = vpop.f32.mrb[49].mxu1 }
 0x1df   : > { %v2024_v13 = vpack.c.bf16 %v741_v11, %v739_v9  ;;  %v743_v14 = vpop.f32.mrb[50].mxu1  ;;  %1379 = vmatprep.mubr.f32.mxu1 %v741_v11 }
 0x1e0   : > { %v2316_v15 = vpack.c.bf16 %v743_v14, %v739_v9  ;;  %1530 = vmatmul.mubr.f32.gmra.mrb[46].mxu0 %v806_v10  ;;  %v745_v16 = vpop.f32.mrb[51].mxu1  ;;  %1380 = vmatmul.mubr.f32.gmra.mrb[80].mxu1 %v739_v9  ;;  %v808_v9 = vld [vmem:[#allocation7 + $0xf0] sm:$0xff]  ;;  %v813_v10 = vld [vmem:[#allocation7 + $0x118] sm:$0xff] }
 0x1e1   : > { %1115 = vst [vmem:[%s3044_s29 + $0x88] sm:$0xff] %v2024_v13  ;;  %v2026_v17 = vpack.c.bf16 %v745_v16, %v743_v14  ;;  %v2314_v18 = vpack.c.bf16 %v745_v16, %v741_v11  ;;  %1384 = vmatprep.mubr.f32.mxu1 %v745_v16  ;;  %1533 = vmatprep.mubr.f32.mxu0 %v811_v12  ;;  %v812_v11 = vld [vmem:[#allocation7 + $0x110] sm:$0xff]  ;;  %v817_v12 = vld [vmem:[#allocation7 + $0x138] sm:$0xff] }
 0x1e2   : > { %v816_v13 = vld [vmem:[#allocation7 + $0x130] sm:$0xff]  ;;  %v825_v16 = vld [vmem:[#allocation7 + $0x178] sm:$0xff] }
 0x1e3   : > { %1117 = vst [vmem:[%s3044_s29 + $0x98] sm:$0xff] %v2026_v17  ;;  %2315 = vmatprep.subr.bf16.mxu0 %v2314_v18  ;;  %v824_v17 = vld [vmem:[#allocation7 + $0x170] sm:$0xff]  ;;  %v829_v18 = vld [vmem:[#allocation7 + $0x198] sm:$0xff] }
 0x1e4   : > { %1534 = vmatmul.mubr.f32.gmra.mrb[48].mxu0 %v810_v19  ;;  %1385 = vmatmul.mubr.f32.gmra.mrb[82].mxu1 %v743_v14  ;;  %v821_v14 = vld [vmem:[#allocation7 + $0x158] sm:$0xff]  ;;  %v828_v19 = vld [vmem:[#allocation7 + $0x190] sm:$0xff] }
 0x1e5   : > { %2317 = vmatpush1.bf16.xpose.msra.mxu0 %v2316_v15  ;;  %v749_v21 = vpop.f32.mrb[52].mxu1  ;;  %1537 = vmatprep.mubr.f32.mxu0 %v815_v20  ;;  %v820_v15 = vld [vmem:[#allocation7 + $0x150] sm:$0xff]  ;;  %v833_v20 = vld [vmem:[#allocation7 + $0x1b8] sm:$0xff] }
 0x1e6   : > { %v751_v23 = vpop.f32.mrb[53].mxu1 }
 0x1e7   : > { %v2028_v25 = vpack.c.bf16 %v751_v23, %v749_v21  ;;  %v753_v26 = vpop.f32.mrb[54].mxu1  ;;  %1389 = vmatprep.mubr.f32.mxu1 %v751_v23 }
 0x1e8   : > { %v2320_v27 = vpack.c.bf16 %v753_v26, %v749_v21  ;;  %1538 = vmatmul.mubr.f32.gmra.mrb[50].mxu0 %v814_v22  ;;  %v755_v28 = vpop.f32.mrb[55].mxu1  ;;  %1390 = vmatmul.mubr.f32.gmra.mrb[84].mxu1 %v749_v21  ;;  %v832_v21 = vld [vmem:[#allocation7 + $0x1b0] sm:$0xff]  ;;  %v837_v22 = vld [vmem:[#allocation7 + $0x1d8] sm:$0xff] }
 0x1e9   : > { %1119 = vst [vmem:[%s3044_s29 + $0xa8] sm:$0xff] %v2028_v25  ;;  %v2030_v29 = vpack.c.bf16 %v755_v28, %v753_v26  ;;  %v2318_v30 = vpack.c.bf16 %v755_v28, %v751_v23  ;;  %1394 = vmatprep.mubr.f32.mxu1 %v755_v28  ;;  %1541 = vmatprep.mubr.f32.mxu0 %v819_v24  ;;  %v836_v23 = vld [vmem:[#allocation7 + $0x1d0] sm:$0xff]  ;;  %v841_v24 = vld [vmem:[#allocation7 + $0x1f8] sm:$0xff] }
 0x1ea   : > { %v840_v25 = vld [vmem:[#allocation7 + $0x1f0] sm:$0xff] }
 0x1eb   : > { %1121 = vst [vmem:[%s3044_s29 + $0xb8] sm:$0xff] %v2030_v29  ;;  %2319 = vmatprep.subr.bf16.mxu0 %v2318_v30 }
 0x1ec   : > { %1542 = vmatmul.mubr.f32.gmra.mrb[52].mxu0 %v818_v32  ;;  %1395 = vmatmul.mubr.f32.gmra.mrb[86].mxu1 %v753_v26 }
 0x1ed   : > { %2321 = vmatpush1.bf16.xpose.msra.mxu0 %v2320_v27  ;;  %v759_v34 = vpop.f32.mrb[56].mxu1  ;;  %1545 = vmatprep.mubr.f32.mxu0 %v823_v33 }
 0x1ee   : > { %v761_v36 = vpop.f32.mrb[57].mxu1 }
 0x1ef   : > { %v2032_v38 = vpack.c.bf16 %v761_v36, %v759_v34  ;;  %v763_v39 = vpop.f32.mrb[58].mxu1  ;;  %1399 = vmatprep.mubr.f32.mxu1 %v761_v36 }
 0x1f0   : > { %v2324_v40 = vpack.c.bf16 %v763_v39, %v759_v34  ;;  %1546 = vmatmul.mubr.f32.gmra.mrb[54].mxu0 %v822_v35  ;;  %v765_v41 = vpop.f32.mrb[59].mxu1  ;;  %1400 = vmatmul.mubr.f32.gmra.mrb[88].mxu1 %v759_v34 }
 0x1f1   : > { %1123 = vst [vmem:[%s3044_s29 + $0xc8] sm:$0xff] %v2032_v38  ;;  %v2034_v42 = vpack.c.bf16 %v765_v41, %v763_v39  ;;  %v2322_v31 = vpack.c.bf16 %v765_v41, %v761_v36  ;;  %1404 = vmatprep.mubr.f32.mxu1 %v765_v41  ;;  %1549 = vmatprep.mubr.f32.mxu0 %v827_v37 }
 0x1f3   : > { %1125 = vst [vmem:[%s3044_s29 + $0xd8] sm:$0xff] %v2034_v42  ;;  %2323 = vmatprep.subr.bf16.mxu0 %v2322_v31 }
 0x1f4   : > { %1550 = vmatmul.mubr.f32.gmra.mrb[56].mxu0 %v826_v43  ;;  %1405 = vmatmul.mubr.f32.gmra.mrb[90].mxu1 %v763_v39 }
 0x1f5   : > { %2325 = vmatpush1.bf16.xpose.msra.mxu0 %v2324_v40  ;;  %v769_v45 = vpop.f32.mrb[60].mxu1  ;;  %1553 = vmatprep.mubr.f32.mxu0 %v831_v44 }
 0x1f6   : > { %v771_v47 = vpop.f32.mrb[61].mxu1 }
 0x1f7   : > { %v2036_v49 = vpack.c.bf16 %v771_v47, %v769_v45  ;;  %v773_v50 = vpop.f32.mrb[62].mxu1  ;;  %1409 = vmatprep.mubr.f32.mxu1 %v771_v47 }
 0x1f8   : > { %v2328_v51 = vpack.c.bf16 %v773_v50, %v769_v45  ;;  %1554 = vmatmul.mubr.f32.gmra.mrb[58].mxu0 %v830_v46  ;;  %v775_v52 = vpop.f32.mrb[63].mxu1  ;;  %1410 = vmatmul.mubr.f32.gmra.mrb[92].mxu1 %v769_v45 }
 0x1f9   : > { %1127 = vst [vmem:[%s3044_s29 + $0xe8] sm:$0xff] %v2036_v49  ;;  %v2038_v53 = vpack.c.bf16 %v775_v52, %v773_v50  ;;  %v2326_v54 = vpack.c.bf16 %v775_v52, %v771_v47  ;;  %1414 = vmatprep.mubr.f32.mxu1 %v775_v52  ;;  %1557 = vmatprep.mubr.f32.mxu0 %v835_v48 }
 0x1fb   : > { %1129 = vst [vmem:[%s3044_s29 + $0xf8] sm:$0xff] %v2038_v53  ;;  %2327 = vmatprep.subr.bf16.mxu0 %v2326_v54 }
 0x1fc   : > { %1558 = vmatmul.mubr.f32.gmra.mrb[60].mxu0 %v834_v55  ;;  %1415 = vmatmul.mubr.f32.gmra.mrb[94].mxu1 %v773_v50 }
 0x1fd   : > { %2329 = vmatpush1.bf16.xpose.msra.mxu0 %v2328_v51  ;;  %1561 = vmatprep.mubr.f32.mxu0 %v839_v0 }
 0x200   : > { %1562 = vmatmul.mubr.f32.gmra.mrb[62].mxu0 %v838_v56 }
 0x201   : > { %1630 = vmatprep.mubr.f32.mxu0 %v781_v57 }
 0x204   : > { %1631 = vmatmul.mubr.f32.vlgmr.msra.gmra.mrb[32].mxu0 %v780_v58 }
 0x205   : > { %1635 = vmatprep.mubr.f32.mxu0 %v785_v59 }
 0x208   : > { %1636 = vmatmul.mubr.f32.gmra.mrb[64].mxu0 %v784_v60 }
 0x209   : > { %1639 = vmatprep.mubr.f32.mxu0 %v789_v61 }
 0x20c   : > { %1640 = vmatmul.mubr.f32.gmra.mrb[66].mxu0 %v788_v62 }
 0x20d   : > { %1643 = vmatprep.mubr.f32.mxu0 %v793_v63 }
 0x210   : > { %1644 = vmatmul.mubr.f32.gmra.mrb[68].mxu0 %v792_v1 }
 0x211   : > { %1647 = vmatprep.mubr.f32.mxu0 %v797_v2 }
 0x214   : > { %1648 = vmatmul.mubr.f32.gmra.mrb[70].mxu0 %v796_v3 }
 0x215   : > { %1651 = vmatprep.mubr.f32.mxu0 %v801_v4 }
 0x218   : > { %1652 = vmatmul.mubr.f32.gmra.mrb[72].mxu0 %v800_v5 }
 0x219   : > { %1655 = vmatprep.mubr.f32.mxu0 %v805_v6 }
 0x21c   : > { %1656 = vmatmul.mubr.f32.gmra.mrb[74].mxu0 %v804_v7 }
 0x21d   : > { %1659 = vmatprep.mubr.f32.mxu0 %v809_v8 }
 0x220   : > { %1660 = vmatmul.mubr.f32.gmra.mrb[76].mxu0 %v808_v9 }
 0x221   : > { %1663 = vmatprep.mubr.f32.mxu0 %v813_v10 }
 0x224   : > { %1664 = vmatmul.mubr.f32.gmra.mrb[78].mxu0 %v812_v11 }
 0x225   : > { %1667 = vmatprep.mubr.f32.mxu0 %v817_v12 }
 0x228   : > { %1668 = vmatmul.mubr.f32.gmra.mrb[80].mxu0 %v816_v13 }
 0x229   : > { %1671 = vmatprep.mubr.f32.mxu0 %v821_v14 }
 0x22c   : > { %1672 = vmatmul.mubr.f32.gmra.mrb[82].mxu0 %v820_v15 }
 0x22d   : > { %1675 = vmatprep.mubr.f32.mxu0 %v825_v16 }
 0x230   : > { %1676 = vmatmul.mubr.f32.gmra.mrb[84].mxu0 %v824_v17 }
 0x231   : > { %1679 = vmatprep.mubr.f32.mxu0 %v829_v18 }
 0x234   : > { %1680 = vmatmul.mubr.f32.gmra.mrb[86].mxu0 %v828_v19 }
 0x235   : > { %1683 = vmatprep.mubr.f32.mxu0 %v833_v20 }
 0x238   : > { %1684 = vmatmul.mubr.f32.gmra.mrb[88].mxu0 %v832_v21 }
 0x239   : > { %1687 = vmatprep.mubr.f32.mxu0 %v837_v22 }
 0x23c   : > { %1688 = vmatmul.mubr.f32.gmra.mrb[90].mxu0 %v836_v23 }
 0x23d   : > { %1691 = vmatprep.mubr.f32.mxu0 %v841_v24 }
 0x240   : > { %1692 = vmatmul.mubr.f32.gmra.mrb[92].mxu0 %v840_v25 }
 0x253   : > { %v2074_v26 = vpop.f32.mrb[0].mxu0 }
 0x254   : > { %v2075_v27 = vpop.f32.mrb[1].mxu0 }
 0x255   : > { %v2076_v28 = vadd.f32 %v2075_v27, %v2074_v26 }
 0x257   : > { %v2077_v29 = vpop.f32.mrb[2].mxu0 }
 0x258   : > { %v2078_v30 = vpop.f32.mrb[3].mxu0 }
 0x259   : > { %v3078_v32 = vadd.f32 %v2078_v30, %v2077_v29 }
 0x25b   : > { %v2080_v33 = vpop.f32.mrb[4].mxu0 }
 0x25c   : > { %v2081_v34 = vpop.f32.mrb[5].mxu0 }
 0x25d   : > { %v3080_v35 = vadd.f32 %v2081_v34, %v2080_v33 }
 0x25f   : > { %v2083_v36 = vpop.f32.mrb[6].mxu0 }
 0x260   : > { %v2084_v37 = vpop.f32.mrb[7].mxu0 }
 0x261   : > { %v3082_v38 = vadd.f32 %v2084_v37, %v2083_v36 }
 0x263   : > { %v2086_v39 = vpop.f32.mrb[8].mxu0 }
 0x264   : > { %v2087_v40 = vpop.f32.mrb[9].mxu0 }
 0x265   : > { %v3084_v41 = vadd.f32 %v2087_v40, %v2086_v39 }
 0x267   : > { %v2089_v42 = vpop.f32.mrb[10].mxu0 }
 0x268   : > { %v2090_v31 = vpop.f32.mrb[11].mxu0 }
 0x269   : > { %v3086_v43 = vadd.f32 %v2090_v31, %v2089_v42 }
 0x26b   : > { %v2092_v44 = vpop.f32.mrb[12].mxu0 }
 0x26c   : > { %v2093_v45 = vpop.f32.mrb[13].mxu0 }
 0x26d   : > { %v3088_v46 = vadd.f32 %v2093_v45, %v2092_v44 }
 0x26f   : > { %v2095_v47 = vpop.f32.mrb[14].mxu0 }
 0x270   : > { %v2096_v48 = vpop.f32.mrb[15].mxu0 }
 0x271   : > { %v3090_v49 = vadd.f32 %v2096_v48, %v2095_v47 }
 0x273   : > { %v2098_v50 = vpop.f32.mrb[16].mxu0 }
 0x274   : > { %v2099_v51 = vpop.f32.mrb[17].mxu0 }
 0x275   : > { %v3092_v52 = vadd.f32 %v2099_v51, %v2098_v50 }
 0x277   : > { %v2101_v53 = vpop.f32.mrb[18].mxu0 }
 0x278   : > { %v2102_v54 = vpop.f32.mrb[19].mxu0 }
 0x279   : > { %v3094_v55 = vadd.f32 %v2102_v54, %v2101_v53 }
 0x27b   : > { %v2104_v0 = vpop.f32.mrb[20].mxu0 }
 0x27c   : > { %v2105_v56 = vpop.f32.mrb[21].mxu0 }
 0x27d   : > { %v3096_v57 = vadd.f32 %v2105_v56, %v2104_v0 }
 0x27f   : > { %v2107_v58 = vpop.f32.mrb[22].mxu0 }
 0x280   : > { %v2108_v59 = vpop.f32.mrb[23].mxu0 }
 0x281   : > { %v3098_v60 = vadd.f32 %v2108_v59, %v2107_v58 }
 0x283   : > { %v2110_v61 = vpop.f32.mrb[24].mxu0 }
 0x284   : > { %v2111_v62 = vpop.f32.mrb[25].mxu0 }
 0x285   : > { %v3100_v63 = vadd.f32 %v2111_v62, %v2110_v61 }
 0x287   : > { %v2113_v1 = vpop.f32.mrb[26].mxu0 }
 0x288   : > { %v2114_v2 = vpop.f32.mrb[27].mxu0 }
 0x289   : > { %v3102_v3 = vadd.f32 %v2114_v2, %v2113_v1 }
 0x28b   : > { %v2116_v4 = vpop.f32.mrb[28].mxu0 }
 0x28c   : > { %v2117_v5 = vpop.f32.mrb[29].mxu0 }
 0x28d   : > { %v3104_v6 = vadd.f32 %v2117_v5, %v2116_v4 }
 0x28f   : > { %v2119_v7 = vpop.f32.mrb[30].mxu0 }
 0x290   : > { %v2120_v8 = vpop.f32.mrb[31].mxu0 }
 0x291   : > { %v3106_v9 = vadd.f32 %v2120_v8, %v2119_v7 }
 0x293   : > { %v2154_v10 = vpop.f32.mrb[64].mxu1 }
 0x294   : > { %v2155_v11 = vpop.f32.mrb[65].mxu1 }
 0x295   : > { %v2156_v12 = vadd.f32 %v2155_v11, %v2154_v10 }
 0x297   : > { %v1342_v13 = vadd.f32 %v2156_v12, %v2076_v28  ;;  %v2157_v14 = vpop.f32.mrb[66].mxu1 }
 0x298   : > { %v2158_v15 = vpop.f32.mrb[67].mxu1 }
 0x299   : > { %1420 = vst [vmem:[%s3119_s15] sm:$0xff] %v1342_v13  ;;  %v2159_v16 = vadd.f32 %v2158_v15, %v2157_v14 }
 0x29a   : > { %2605 = shalt.err (!%p2602_p4)
}
 0x29b   : > { %s2606_s18 = scalar_lea.hbm %s3112_s16, 4096  ;;  %s2610_s20 = scalar_lea.hbm %s3269_s4, 8192 }
 0x29c   : > { %p2607_p9 = scmp.ne.s32.totalorder %s3112_s16, %s2606_s18  ;;  %p2611_p8 = scmp.lt.u32.totalorder %s3112_s16, %s3269_s4 }
 0x29d   : > { %p2612_p13 = scmp.lt.u32.totalorder %s2610_s20, %s2606_s18  ;;  %p2614_p10 = scmp.lt.u32.totalorder %s2606_s18, %s3112_s16 }
 0x29e   : > { %p2608_p0 = pnand %p2607_p9, %p2928_p5 }
 0x29f   : > { %p2613_p6 = por %p2612_p13, %p2611_p8 }
 0x2a0   : > { %p2609_p11 = pneg %p2608_p0 }
 0x2a1   : > { %p2615_p3 = por %p2614_p10, %p2613_p6 }
 0x2a3   : > { %p2616_p7 = pnand %p2615_p3, %p2609_p11 }
 0x2a5   : > { %2619 = shalt.err (!%p2616_p7)
}
 0x2a6   : > { %s2740_s13 = smov 256   ;;  %s2741_s19 = smov 16   ;;  %v1347_v17 = vadd.f32 %v2159_v16, %v3078_v32  ;;  %v1507_v18 = vpop.f32.mrb[34].mxu0  ;;  %v2160_v19 = vpop.f32.mrb[68].mxu1 }
 0x2a7   : > { %2346 = dma.vmem_to_hbm [thread:$0]  (%p2928_p5), %s3115_s11, 4096, %s3112_s16, %s1698_s17, %s2740_s13, %s2740_s13, %s2741_s19   ;;  %v1508_v20 = vpop.f32.mrb[35].mxu0  ;;  %v2161_v21 = vpop.f32.mrb[69].mxu1 }
 0x2a8   : > { %1421 = vst [vmem:[%s3119_s15 + $0x8] sm:$0xff] %v1347_v17  ;;  %v2162_v22 = vadd.f32 %v2161_v21, %v2160_v19  ;;  %v1511_v24 = vpop.f32.mrb[36].mxu0  ;;  %v2163_v25 = vpop.f32.mrb[70].mxu1  ;;  %s1930_s16 = sshll.u32 %s2979_s12, 3  ;;  %s1702_s11 = sand.u32 1, %s2802_s25  }
 0x2a9   : > { %v1512_v26 = vpop.f32.mrb[37].mxu0  ;;  %v2164_v27 = vpop.f32.mrb[71].mxu1  ;;  %s2041_s17 = sshll.u32 %s2802_s25, 11  ;;  %s3176_s10 = scalar_lea.vmem [#allocation13], %s1930_s16 }
 0x2aa   : > { %v1352_v23 = vadd.f32 %v2162_v22, %v3080_v35  ;;  %v2165_v28 = vadd.f32 %v2164_v27, %v2163_v25  ;;  %v1515_v30 = vpop.f32.mrb[38].mxu0  ;;  %v2166_v32 = vpop.f32.mrb[72].mxu1  ;;  %s1754_s30 = sshll.u32 %s3176_s10, 4  ;;  %s1738_s18 = sshll.u32 %s3119_s15, 4  ;;  %s3188_s18 = int_to_ptr.vmem [resolvable:$true] %s1738_s18  ;;  %s3191_s30 = int_to_ptr.vmem [resolvable:$true] %s1754_s30 }
 0x2ab   : > { %v1516_v33 = vpop.f32.mrb[39].mxu0  ;;  %v2167_v34 = vpop.f32.mrb[73].mxu1  ;;  %s3184_s29 = scalar_lea.hbm %s3270_s5, %s2041_s17  ;;  %s2003_s20 = sshll.u32 %s2802_s25, 7 }
 0x2ac   : > { %1422 = vst [vmem:[%s3119_s15 + $0x10] sm:$0xff] %v1352_v23  ;;  %v1357_v29 = vadd.f32 %v2165_v28, %v3082_v38  ;;  %v2168_v36 = vadd.f32 %v2167_v34, %v2166_v32  ;;  %v1519_v39 = vpop.f32.mrb[40].mxu0  ;;  %v2169_v35 = vpop.f32.mrb[74].mxu1  ;;  %s3196_s13 = scalar_lea.hbm %s3271_s6, %s2003_s20  ;;  %s3198_s19 = scalar_lea.sflag [#allocation12], %s1702_s11 }
 0x2ad   : > { %v1520_v40 = vpop.f32.mrb[41].mxu0  ;;  %v2170_v42 = vpop.f32.mrb[75].mxu1  ;;  %s2620_s25 = scalar_lea.vmem %s3188_s18, 2048  ;;  %s2742_s16 = smov [#allocation11]  }
 0x2ae   : > { %1423 = vst [vmem:[%s3119_s15 + $0x18] sm:$0xff] %v1357_v29  ;;  %v1362_v37 = vadd.f32 %v2168_v36, %v3084_v41  ;;  %v2171_v31 = vadd.f32 %v2170_v42, %v2169_v35  ;;  %v1523_v45 = vpop.f32.mrb[42].mxu0  ;;  %v2172_v38 = vpop.f32.mrb[76].mxu1  ;;  %p2621_p12 = scmp.ne.s32.totalorder %s3188_s18, %s2620_s25  ;;  %s2624_s17 = sshll.u32 %s2742_s16, 4  ;;  %s2625_s17 = int_to_ptr.vmem [resolvable:$false] %s2624_s17 }
 0x2af   : > { %v1524_v47 = vpop.f32.mrb[43].mxu0  ;;  %v2173_v48 = vpop.f32.mrb[77].mxu1  ;;  %s2626_s12 = scalar_lea.vmem %s2625_s17, 4096  ;;  %p2627_p4 = scmp.lt.s32.totalorder %s3188_s18, %s2625_s17 }
 0x2b0   : > { %1424 = vst [vmem:[%s3119_s15 + $0x20] sm:$0xff] %v1362_v37  ;;  %v1367_v44 = vadd.f32 %v2171_v31, %v3086_v43  ;;  %v2174_v50 = vadd.f32 %v2173_v48, %v2172_v38  ;;  %v1527_v53 = vpop.f32.mrb[44].mxu0  ;;  %v2175_v41 = vpop.f32.mrb[78].mxu1  ;;  %p2622_p2 = pnand %p2621_p12, %p2928_p5  ;;  %p2628_p9 = scmp.lt.s32.totalorder %s2626_s12, %s2620_s25 }
 0x2b1   : > { %v1528_v54 = vpop.f32.mrb[45].mxu0  ;;  %v2176_v0 = vpop.f32.mrb[79].mxu1 }
 0x2b2   : > { %1425 = vst [vmem:[%s3119_s15 + $0x28] sm:$0xff] %v1367_v44  ;;  %v1372_v51 = vadd.f32 %v2174_v50, %v3088_v46  ;;  %v2177_v56 = vadd.f32 %v2176_v0, %v2175_v41  ;;  %p2623_p1 = pneg %p2622_p2  ;;  %p2629_p0 = por %p2628_p9, %p2627_p4 }
 0x2b3   : > { %v1531_v59 = vpop.f32.mrb[46].mxu0  ;;  %v2178_v43 = vpop.f32.mrb[80].mxu1 }
 0x2b4   : > { %1426 = vst [vmem:[%s3119_s15 + $0x30] sm:$0xff] %v1372_v51  ;;  %v1377_v58 = vadd.f32 %v2177_v56, %v3090_v49  ;;  %v1532_v61 = vpop.f32.mrb[47].mxu0  ;;  %v2179_v62 = vpop.f32.mrb[81].mxu1  ;;  %p2630_p11 = pnand %p2629_p0, %p2623_p1 }
 0x2b5   : > { %v2180_v1 = vadd.f32 %v2179_v62, %v2178_v43 }
 0x2b6   : > { %1427 = vst [vmem:[%s3119_s15 + $0x38] sm:$0xff] %v1377_v58 }
 0x2b7   : > { %v1382_v2 = vadd.f32 %v2180_v1, %v3092_v52  ;;  %v1535_v4 = vpop.f32.mrb[48].mxu0  ;;  %v2181_v46 = vpop.f32.mrb[82].mxu1 }
 0x2b8   : > { %v1536_v5 = vpop.f32.mrb[49].mxu0  ;;  %v2182_v7 = vpop.f32.mrb[83].mxu1 }
 0x2b9   : > { %1428 = vst [vmem:[%s3119_s15 + $0x40] sm:$0xff] %v1382_v2  ;;  %v2183_v8 = vadd.f32 %v2182_v7, %v2181_v46 }
 0x2bb   : > { %v1387_v10 = vadd.f32 %v2183_v8, %v3094_v55  ;;  %v1539_v11 = vpop.f32.mrb[50].mxu0  ;;  %v2184_v49 = vpop.f32.mrb[84].mxu1 }
 0x2bc   : > { %v1540_v12 = vpop.f32.mrb[51].mxu0  ;;  %v2185_v13 = vpop.f32.mrb[85].mxu1 }
 0x2bd   : > { %1429 = vst [vmem:[%s3119_s15 + $0x48] sm:$0xff] %v1387_v10  ;;  %v2186_v14 = vadd.f32 %v2185_v13, %v2184_v49 }
 0x2bf   : > { %v1392_v15 = vadd.f32 %v2186_v14, %v3096_v57  ;;  %v1543_v16 = vpop.f32.mrb[52].mxu0  ;;  %v2187_v52 = vpop.f32.mrb[86].mxu1 }
 0x2c0   : > { %v1544_v17 = vpop.f32.mrb[53].mxu0  ;;  %v2188_v18 = vpop.f32.mrb[87].mxu1 }
 0x2c1   : > { %1430 = vst [vmem:[%s3119_s15 + $0x50] sm:$0xff] %v1392_v15  ;;  %v2189_v19 = vadd.f32 %v2188_v18, %v2187_v52 }
 0x2c3   : > { %v1397_v20 = vadd.f32 %v2189_v19, %v3098_v60  ;;  %v1547_v21 = vpop.f32.mrb[54].mxu0  ;;  %v2190_v55 = vpop.f32.mrb[88].mxu1 }
 0x2c4   : > { %v1548_v22 = vpop.f32.mrb[55].mxu0  ;;  %v2191_v23 = vpop.f32.mrb[89].mxu1 }
 0x2c5   : > { %1431 = vst [vmem:[%s3119_s15 + $0x58] sm:$0xff] %v1397_v20  ;;  %v2192_v24 = vadd.f32 %v2191_v23, %v2190_v55 }
 0x2c7   : > { %v1402_v57 = vadd.f32 %v2192_v24, %v3100_v63  ;;  %v1551_v25 = vpop.f32.mrb[56].mxu0  ;;  %v2193_v26 = vpop.f32.mrb[90].mxu1 }
 0x2c8   : > { %v1552_v27 = vpop.f32.mrb[57].mxu0  ;;  %v2194_v28 = vpop.f32.mrb[91].mxu1 }
 0x2c9   : > { %1432 = vst [vmem:[%s3119_s15 + $0x60] sm:$0xff] %v1402_v57  ;;  %v2195_v29 = vadd.f32 %v2194_v28, %v2193_v26 }
 0x2cb   : > { %v1407_v60 = vadd.f32 %v2195_v29, %v3102_v3  ;;  %v1555_v30 = vpop.f32.mrb[58].mxu0  ;;  %v2196_v32 = vpop.f32.mrb[92].mxu1 }
 0x2cc   : > { %v1556_v33 = vpop.f32.mrb[59].mxu0  ;;  %v2197_v34 = vpop.f32.mrb[93].mxu1 }
 0x2cd   : > { %1433 = vst [vmem:[%s3119_s15 + $0x68] sm:$0xff] %v1407_v60  ;;  %v2198_v36 = vadd.f32 %v2197_v34, %v2196_v32 }
 0x2cf   : > { %v1412_v63 = vadd.f32 %v2198_v36, %v3104_v6  ;;  %v1559_v37 = vpop.f32.mrb[60].mxu0  ;;  %v2199_v39 = vpop.f32.mrb[94].mxu1 }
 0x2d0   : > { %v1560_v35 = vpop.f32.mrb[61].mxu0  ;;  %v2200_v40 = vpop.f32.mrb[95].mxu1 }
 0x2d1   : > { %1434 = vst [vmem:[%s3119_s15 + $0x70] sm:$0xff] %v1412_v63  ;;  %v2201_v3 = vadd.f32 %v2200_v40, %v2199_v39 }
 0x2d3   : > { %v1417_v6 = vadd.f32 %v2201_v3, %v3106_v9  ;;  %v1563_v42 = vpop.f32.mrb[62].mxu0 }
 0x2d4   : > { %v1564_v31 = vpop.f32.mrb[63].mxu0 }
 0x2d5   : > { %1435 = vst [vmem:[%s3119_s15 + $0x78] sm:$0xff] %v1417_v6 }
 0x2d6   : > { %2633 = shalt.err (!%p2630_p11)
}
 0x2d7   : > { %s2634_s15 = scalar_lea.hbm %s3184_s29, 2048  ;;  %s2638_s20 = scalar_lea.hbm %s3270_s5, 4096 }
 0x2d8   : > { %p2635_p8 = scmp.ne.s32.totalorder %s3184_s29, %s2634_s15  ;;  %p2639_p10 = scmp.lt.u32.totalorder %s3184_s29, %s3270_s5 }
 0x2d9   : > { %p2640_p3 = scmp.lt.u32.totalorder %s2638_s20, %s2634_s15  ;;  %p2642_p12 = scmp.lt.u32.totalorder %s2634_s15, %s3184_s29 }
 0x2da   : > { %p2636_p13 = pnand %p2635_p8, %p2928_p5 }
 0x2db   : > { %p2641_p7 = por %p2640_p3, %p2639_p10 }
 0x2dc   : > { %p2637_p6 = pneg %p2636_p13 }
 0x2dd   : > { %p2643_p2 = por %p2642_p12, %p2641_p7 }
 0x2df   : > { %p2644_p1 = pnand %p2643_p2, %p2637_p6 }
 0x2e1   : > { %2647 = shalt.err (!%p2644_p1)
}
 0x2e2   : > { %s2743_s25 = smov 128   ;;  %s2744_s16 = smov 8   ;;  %v1632_v9 = vpop.f32.mrb[32].mxu0 }
 0x2e3   : > { %2347 = dma.vmem_to_hbm [thread:$0]  (%p2928_p5), %s3188_s18, 2048, %s3184_s29, %s3198_s19, %s2743_s25, %s2743_s25, %s2744_s16   ;;  %v1634_v44 = vpop.f32.mrb[33].mxu0 }
 0x2e4   : > { %1696 = vst [vmem:[%s3176_s10] sm:$0xff] %v1632_v9  ;;  %s2648_s17 = scalar_lea.vmem %s3191_s30, 128  ;;  %s2745_s12 = smov [#allocation13]  }
 0x2e5   : > { %p2649_p4 = scmp.ne.s32.totalorder %s3191_s30, %s2648_s17  ;;  %s2652_s15 = sshll.u32 %s2745_s12, 4  ;;  %s2653_s15 = int_to_ptr.vmem [resolvable:$false] %s2652_s15 }
 0x2e6   : > { %s2654_s11 = scalar_lea.vmem %s2653_s15, 256  ;;  %p2655_p11 = scmp.lt.s32.totalorder %s3191_s30, %s2653_s15 }
 0x2e7   : > { %p2650_p9 = pnand %p2649_p4, %p2928_p5  ;;  %p2656_p8 = scmp.lt.s32.totalorder %s2654_s11, %s2648_s17 }
 0x2e9   : > { %p2651_p0 = pneg %p2650_p9  ;;  %p2657_p13 = por %p2656_p8, %p2655_p11 }
 0x2eb   : > { %p2658_p6 = pnand %p2657_p13, %p2651_p0 }
 0x2ed   : > { %2661 = shalt.err (!%p2658_p6)
}
 0x2ee   : > { %s2662_s10 = scalar_lea.hbm %s3196_s13, 128  ;;  %s2666_s27 = scalar_lea.hbm %s3271_s6, 256 }
 0x2ef   : > { %p2663_p10 = scmp.ne.s32.totalorder %s3196_s13, %s2662_s10  ;;  %p2667_p12 = scmp.lt.u32.totalorder %s3196_s13, %s3271_s6 }
 0x2f0   : > { %p2668_p2 = scmp.lt.u32.totalorder %s2666_s27, %s2662_s10  ;;  %p2670_p4 = scmp.lt.u32.totalorder %s2662_s10, %s3196_s13 }
 0x2f1   : > { %p2664_p3 = pnand %p2663_p10, %p2928_p5 }
 0x2f2   : > { %p2669_p1 = por %p2668_p2, %p2667_p12 }
 0x2f3   : > { %p2665_p7 = pneg %p2664_p3 }
 0x2f4   : > { %p2671_p9 = por %p2670_p4, %p2669_p1 }
 0x2f6   : > { %p2672_p0 = pnand %p2671_p9, %p2665_p7 }
 0x2f8   : > { %2675 = shalt.err (!%p2672_p0)
}
 0x2f9   : > { %2348 = dma.vmem_to_hbm [thread:$0]  (%p2928_p5), %s3191_s30, 128, %s3196_s13, %s3198_s19   ;;  %v1637_v45 = vpop.f32.mrb[64].mxu0 }
 0x2fa   : > { %v1638_v38 = vpop.f32.mrb[65].mxu0 }
 0x2fb   : > { %v1641_v47 = vpop.f32.mrb[66].mxu0 }
 0x2fc   : > { %v1642_v48 = vpop.f32.mrb[67].mxu0 }
 0x2fd   : > { %v1645_v50 = vpop.f32.mrb[68].mxu0 }
 0x2fe   : > { %v1646_v51 = vpop.f32.mrb[69].mxu0 }
 0x2ff   : > { %v1649_v53 = vpop.f32.mrb[70].mxu0 }
 0x300   : > { %v1650_v41 = vpop.f32.mrb[71].mxu0 }
 0x301   : > { %v1653_v54 = vpop.f32.mrb[72].mxu0 }
 0x302   : > { %v1654_v0 = vpop.f32.mrb[73].mxu0 }
 0x303   : > { %v1657_v56 = vpop.f32.mrb[74].mxu0 }
 0x304   : > { %v1658_v58 = vpop.f32.mrb[75].mxu0 }
 0x305   : > { %v1661_v59 = vpop.f32.mrb[76].mxu0 }
 0x306   : > { %v1662_v43 = vpop.f32.mrb[77].mxu0 }
 0x307   : > { %v1665_v61 = vpop.f32.mrb[78].mxu0 }
 0x308   : > { %v1666_v62 = vpop.f32.mrb[79].mxu0 }
 0x309   : > { %v1669_v1 = vpop.f32.mrb[80].mxu0 }
 0x30a   : > { %v1670_v2 = vpop.f32.mrb[81].mxu0 }
 0x30b   : > { %v1673_v4 = vpop.f32.mrb[82].mxu0 }
 0x30c   : > { %v1674_v46 = vpop.f32.mrb[83].mxu0 }
 0x30d   : > { %v1677_v5 = vpop.f32.mrb[84].mxu0 }
 0x30e   : > { %v1678_v7 = vpop.f32.mrb[85].mxu0 }
 0x30f   : > { %v1681_v8 = vpop.f32.mrb[86].mxu0 }
 0x310   : > { %v1682_v10 = vpop.f32.mrb[87].mxu0 }
 0x311   : > { %v1685_v11 = vpop.f32.mrb[88].mxu0 }
 0x312   : > { %v1686_v49 = vpop.f32.mrb[89].mxu0 }
 0x313   : > { %v1689_v12 = vpop.f32.mrb[90].mxu0 }
 0x314   : > { %v1690_v13 = vpop.f32.mrb[91].mxu0 }
 0x315   : > { %v1693_v14 = vpop.f32.mrb[92].mxu0 }
 0x316   : > { %v1694_v15 = vpop.f32.mrb[93].mxu0 }
 0x317 PF: > { %s1766_s8 = sand.u32 1, %s2714_s21   ;;  %p3290_p5 = scmp.ne.s32.totalorder %s3277_s28, 0 }
 0x318   : > { %p3291_p11 = scmp.ge.s32.totalorder %s2726_s24, 2  ;;  %s1767_s30 = scalar_lea.sflag [#allocation4], %s1766_s8 }
 0x31a   : > { %p2367_p8 = pnand %p3291_p11, %p3290_p5 }
 0x31c   : > { %2705 = dma.done.wait (!%p2367_p8), %s1767_s30, 4096  }
 0x31d   : > { %2707 = vsyncadd (!%p2367_p8), %s1767_s30, 4294963200  ;;  %s3292_s13 = sadd.s32 4294967294, %s2726_s24  }
 0x31e   : > { %s1775_s19 = sand.u32 1, %s3292_s13  }
 0x31f   : > { %s1776_s7 = scalar_lea.sflag [#allocation12], %s1775_s19 }
 0x320   : > { %2709 = dma.done.wait (!%p2367_p8), %s1776_s7, 2176  }
 0x321   : > { %2711 = vsyncadd (!%p2367_p8), %s1776_s7, 4294965120  ;;  %p25_p13 = scmp.ge.s32.totalorder %s2914_s9, 4   ;;  %s3293_s21 = smov %s2718_s22 }
 0x322   : > { %s3294_s22 = smov %s2722_s23  ;;  %s3295_s23 = smov %s2924_s14 }
 0x323   : > { %s3296_s24 = smov %s2914_s9  ;;  %27 = sbr.rel (!%p25_p13) target bundleno = 9 (0x9), region = 125 }
 0x32a   :  { %1790 = vsyncpa [#allocation3], 1 }
 0x32b   :  { %1792 = vsyncpa [#allocation3 + $0x1], 1 }
 0x32c   :  { %1793 = vsyncpa [#allocation6], 1 }
 0x32d   :  { %1794 = vsyncpa [#allocation9], 1 }
 0x32e   :  { %1795 = vsyncpa [#allocation4], 1 }
 0x32f   :  { %1797 = vsyncpa [#allocation4 + $0x1], 1 }
 0x330   :  { %1798 = vsyncpa [#allocation12], 1 }
 0x331   :  { %1800 = vsyncpa [#allocation12 + $0x1], 1 }

</bundles_post_ra>
